<compile_context>
chip_gen: v7x
topology: tpu7x:2x2x1
jax: 0.10.0
libtpu: 0.0.40
codegen_flags: <defaults>
</compile_context>

<pallas_src>
import jax
import jax.numpy as jnp
from jax import lax
from jax.experimental import pallas as pl
from jax.experimental.pallas import tpu as pltpu

# Small, forward-consistent logical shapes (module values scaled down):
VOCAB = 50
EMBED = 64     # embedding_length (300 in module)
HIDDEN = 32    # hidden_size (128 in module)
OUTPUT = 18    # output_size (kept at 18)
SEQ = 8        # fix_length (19 in module)
BATCH = 2

# Padded compute shapes (vreg geometry: 8 sublanes x 128 lanes).
B_PAD = 8      # batch -> sublane multiple
E_PAD = 128    # embed -> lane multiple (concat boundary stays tile-aligned)
H_PAD = 128    # hidden -> lane multiple (gate slices land on 128-lane boundaries)
O_PAD = 128    # output -> lane-dense logits store


def lstm_cls_kernel(tokens_ref, emb_ref, w_ref, b_ref, w_fc_ref, b_fc_ref,
                    out_ref, x_buf):
    """Single-program kernel: full sequence + classifier head.

    tokens_ref: SMEM (SEQ, BATCH) int32     (scalar prefetch)
    emb_ref:    VMEM (VOCAB, 1, E_PAD) f32  (padded embedding table)
    w_ref:      VMEM (E_PAD+H_PAD, 4*H_PAD) bf16   [W_ih^T ; W_hh^T], gate order [i,f,g,o]
    b_ref:      VMEM (1, 4*H_PAD) f32       (b_ih + b_hh, zero in padded lanes)
    w_fc_ref:   VMEM (H_PAD, O_PAD) bf16    classifier weight (pre-transposed, padded)
    b_fc_ref:   VMEM (1, O_PAD) f32         classifier bias (padded)
    out_ref:    VMEM (B_PAD, O_PAD) f32     padded logits
    x_buf:      VMEM (B_PAD, E_PAD) f32     scratch for the current timestep's embeddings
    """
    # Padded batch rows stay zero; only the real rows are overwritten each step.
    x_buf[...] = jnp.zeros_like(x_buf)

    def step(t, carry):
        h, c = carry  # f32 (B_PAD, H_PAD) each — live in vregs across the unrolled loop

        # Fused embedding gather: dynamic row lookup from the VMEM-resident table.
        for bb in range(BATCH):
            tok = tokens_ref[t, bb]
            x_buf[pl.ds(bb, 1), :] = emb_ref[tok]        # (1, E_PAD)

        # One combined MXU matmul per timestep: [x_t, h] @ [W_ih^T ; W_hh^T].
        xh = jnp.concatenate(
            [x_buf[...].astype(jnp.bfloat16), h.astype(jnp.bfloat16)], axis=1)
        gates = jnp.dot(xh, w_ref[...],
                        preferred_element_type=jnp.float32) + b_ref[...]

        # Gate slices are 128-lane aligned. Elementwise/EUP math kept in f32.
        i_g = jax.nn.sigmoid(gates[:, 0 * H_PAD:1 * H_PAD])
        f_g = jax.nn.sigmoid(gates[:, 1 * H_PAD:2 * H_PAD])
        g_g = jnp.tanh(gates[:, 2 * H_PAD:3 * H_PAD])
        o_g = jax.nn.sigmoid(gates[:, 3 * H_PAD:4 * H_PAD])

        c_new = f_g * c + i_g * g_g
        h_new = o_g * jnp.tanh(c_new)
        return h_new, c_new

    h0 = jnp.zeros((B_PAD, H_PAD), jnp.float32)
    c0 = jnp.zeros((B_PAD, H_PAD), jnp.float32)
    h_final, _ = lax.fori_loop(0, SEQ, step, (h0, c0), unroll=True)

    # final_output = Linear(final_hidden_state[-1]); lane-dense (B_PAD, 128) store.
    out_ref[...] = (jnp.dot(h_final.astype(jnp.bfloat16), w_fc_ref[...],
                            preferred_element_type=jnp.float32) + b_fc_ref[...])


def _pack_gate_weights(w4h, in_dim, in_pad):
    """PyTorch (4H, in_dim) weight -> padded (in_pad, 4*H_PAD), transposed per gate."""
    out = jnp.zeros((in_pad, 4 * H_PAD), jnp.float32)
    for g in range(4):
        blk = w4h[g * HIDDEN:(g + 1) * HIDDEN, :].T      # (in_dim, HIDDEN)
        out = out.at[:in_dim, g * H_PAD:g * H_PAD + HIDDEN].set(blk)
    return out


@jax.jit
def lstm_classifier_forward(tokens, params):
    """tokens: (SEQ, BATCH) int32. Returns logits (BATCH, OUTPUT) float32."""
    # --- pack / pad parameters (zero-padded lanes keep padded h/c exactly 0) ---
    emb_pad = jnp.zeros((VOCAB, 1, E_PAD), jnp.float32)
    emb_pad = emb_pad.at[:, 0, :EMBED].set(params["embedding"])

    w_x = _pack_gate_weights(params["w_ih"], EMBED, E_PAD)    # (E_PAD, 4*H_PAD)
    w_h = _pack_gate_weights(params["w_hh"], HIDDEN, H_PAD)   # (H_PAD, 4*H_PAD)
    w_comb = jnp.concatenate([w_x, w_h], axis=0).astype(jnp.bfloat16)

    b_sum = params["b_ih"] + params["b_hh"]
    b_pad = jnp.zeros((1, 4 * H_PAD), jnp.float32)
    for g in range(4):
        b_pad = b_pad.at[0, g * H_PAD:g * H_PAD + HIDDEN].set(
            b_sum[g * HIDDEN:(g + 1) * HIDDEN])

    w_fc_pad = jnp.zeros((H_PAD, O_PAD), jnp.float32)
    w_fc_pad = w_fc_pad.at[:HIDDEN, :OUTPUT].set(params["w_fc"].T).astype(jnp.bfloat16)
    b_fc_pad = jnp.zeros((1, O_PAD), jnp.float32).at[0, :OUTPUT].set(params["b_fc"])

    grid_spec = pltpu.PrefetchScalarGridSpec(
        num_scalar_prefetch=1,          # tokens -> SMEM, readable inside the kernel
        grid=(1,),                      # single program; time loop lives in-kernel
        in_specs=[
            pl.BlockSpec((VOCAB, 1, E_PAD), lambda i, tok: (0, 0, 0)),      # emb table
            pl.BlockSpec((E_PAD + H_PAD, 4 * H_PAD), lambda i, tok: (0, 0)),  # W combined
            pl.BlockSpec((1, 4 * H_PAD), lambda i, tok: (0, 0)),            # bias
            pl.BlockSpec((H_PAD, O_PAD), lambda i, tok: (0, 0)),            # W_fc^T
            pl.BlockSpec((1, O_PAD), lambda i, tok: (0, 0)),                # b_fc
        ],
        out_specs=pl.BlockSpec((B_PAD, O_PAD), lambda i, tok: (0, 0)),
        scratch_shapes=[
            pltpu.VMEM((B_PAD, E_PAD), jnp.float32),   # current-timestep embeddings
        ],
    )

    logits_pad = pl.pallas_call(
        lstm_cls_kernel,
        out_shape=jax.ShapeDtypeStruct((B_PAD, O_PAD), jnp.float32),
        grid_spec=grid_spec,
        compiler_params=pltpu.CompilerParams(
            dimension_semantics=("arbitrary",)),
    )(tokens, emb_pad, w_comb, b_pad, w_fc_pad, b_fc_pad)

    return logits_pad[:BATCH, :OUTPUT]


def init_params(key):
    """Deterministic synthetic parameters matching nn.Embedding / nn.LSTM / nn.Linear shapes."""
    ks = jax.random.split(key, 7)
    bound = 1.0 / jnp.sqrt(HIDDEN)
    u = lambda k, shape, b: jax.random.uniform(k, shape, jnp.float32, -b, b)
    return {
        "embedding": jax.random.normal(ks[0], (VOCAB, EMBED), jnp.float32),
        "w_ih": u(ks[1], (4 * HIDDEN, EMBED), bound),
        "w_hh": u(ks[2], (4 * HIDDEN, HIDDEN), bound),
        "b_ih": u(ks[3], (4 * HIDDEN,), bound),
        "b_hh": u(ks[4], (4 * HIDDEN,), bound),
        "w_fc": u(ks[5], (OUTPUT, HIDDEN), 1.0 / jnp.sqrt(HIDDEN)),
        "b_fc": u(ks[6], (OUTPUT,), 1.0 / jnp.sqrt(HIDDEN)),
    }


if __name__ == "__main__":
    key = jax.random.PRNGKey(0)
    pkey, tkey = jax.random.split(key)
    params = init_params(pkey)
    tokens = jax.random.randint(tkey, (SEQ, BATCH), 0, VOCAB, dtype=jnp.int32)

    logits = lstm_classifier_forward(tokens, params)
    jax.block_until_ready(logits)
    assert logits.shape == (BATCH, OUTPUT) and logits.dtype == jnp.float32
    assert bool(jnp.all(jnp.isfinite(logits)))
    print("KERNEL_OK")
</pallas_src>

<mosaic_0001>
module attributes {stable_mosaic.version = 11 : i64} {
  func.func @lstm_cls_kernel(%arg0: i32, %arg1: memref<8x2xi32, #tpu.memory_space<smem>>, %arg2: memref<50x1x128xf32, #tpu.memory_space<vmem>>, %arg3: memref<256x512xbf16, #tpu.memory_space<vmem>>, %arg4: memref<1x512xf32, #tpu.memory_space<vmem>>, %arg5: memref<128x128xbf16, #tpu.memory_space<vmem>>, %arg6: memref<1x128xf32, #tpu.memory_space<vmem>>, %arg7: memref<8x128xf32, #tpu.memory_space<vmem>>, %arg8: memref<8x128xf32, #tpu.memory_space<vmem>>) attributes {dimension_semantics = [#tpu.dimension_semantics<arbitrary>], iteration_bounds = array<i64: 1>, scalar_prefetch = 1 : i64, scratch_operands = 1 : i64, tpu.core_type = #tpu.core_type<tc>, window_params = [{pipeline_mode = #tpu.pipeline_mode<synchronous>, transform_indices = @transform_0, window_bounds = array<i64: 50, 1, 128>}, {pipeline_mode = #tpu.pipeline_mode<synchronous>, transform_indices = @transform_1, window_bounds = array<i64: 256, 512>}, {pipeline_mode = #tpu.pipeline_mode<synchronous>, transform_indices = @transform_2, window_bounds = array<i64: 1, 512>}, {pipeline_mode = #tpu.pipeline_mode<synchronous>, transform_indices = @transform_3, window_bounds = array<i64: 128, 128>}, {pipeline_mode = #tpu.pipeline_mode<synchronous>, transform_indices = @transform_4, window_bounds = array<i64: 1, 128>}, {pipeline_mode = #tpu.pipeline_mode<synchronous>, transform_indices = @transform_5, window_bounds = array<i64: 8, 128>}]} {
    %cst = arith.constant 0.000000e+00 : f32
    %0 = vector.broadcast %cst : f32 to vector<8x128xf32>
    %c0 = arith.constant 0 : index
    %c0_0 = arith.constant 0 : index
    %1 = vector.load %arg8[%c0, %c0_0] : memref<8x128xf32, #tpu.memory_space<vmem>>, vector<8x128xf32>
    tpu.vector_store %arg8[%c0, %c0_0], %0 {strides = array<i32>} : memref<8x128xf32, #tpu.memory_space<vmem>>, vector<8x128xf32>,
    %cst_1 = arith.constant 0.000000e+00 : f32
    %2 = vector.broadcast %cst_1 : f32 to vector<8x128xf32>
    %cst_2 = arith.constant 0.000000e+00 : f32
    %3 = vector.broadcast %cst_2 : f32 to vector<8x128xf32>
    %c0_i32 = arith.constant 0 : i32
    %4 = arith.index_cast %c0_i32 : i32 to index
    %c0_3 = arith.constant 0 : index
    %5 = memref.load %arg1[%4, %c0_3] : memref<8x2xi32, #tpu.memory_space<smem>>
    %6 = arith.index_cast %5 : i32 to index
    %c0_4 = arith.constant 0 : index
    %c0_5 = arith.constant 0 : index
    %7 = vector.load %arg2[%6, %c0_4, %c0_5] : memref<50x1x128xf32, #tpu.memory_space<vmem>>, vector<1x1x128xf32>
    %8 = vector.shape_cast %7 : vector<1x1x128xf32> to vector<1x128xf32>
    %c0_6 = arith.constant 0 : index
    %c0_7 = arith.constant 0 : index
    %9 = vector.load %arg8[%c0_6, %c0_7] : memref<8x128xf32, #tpu.memory_space<vmem>>, vector<1x128xf32>
    tpu.vector_store %arg8[%c0_6, %c0_7], %8 {strides = array<i32>} : memref<8x128xf32, #tpu.memory_space<vmem>>, vector<1x128xf32>,
    %10 = arith.index_cast %c0_i32 : i32 to index
    %c1 = arith.constant 1 : index
    %11 = memref.load %arg1[%10, %c1] : memref<8x2xi32, #tpu.memory_space<smem>>
    %12 = arith.index_cast %11 : i32 to index
    %c0_8 = arith.constant 0 : index
    %c0_9 = arith.constant 0 : index
    %13 = vector.load %arg2[%12, %c0_8, %c0_9] : memref<50x1x128xf32, #tpu.memory_space<vmem>>, vector<1x1x128xf32>
    %14 = vector.shape_cast %13 : vector<1x1x128xf32> to vector<1x128xf32>
    %c1_10 = arith.constant 1 : index
    %c0_11 = arith.constant 0 : index
    %15 = vector.load %arg8[%c1_10, %c0_11] : memref<8x128xf32, #tpu.memory_space<vmem>>, vector<1x128xf32>
    tpu.vector_store %arg8[%c1_10, %c0_11], %14 {strides = array<i32>} : memref<8x128xf32, #tpu.memory_space<vmem>>, vector<1x128xf32>,
    %c0_12 = arith.constant 0 : index
    %c0_13 = arith.constant 0 : index
    %16 = vector.load %arg8[%c0_12, %c0_13] : memref<8x128xf32, #tpu.memory_space<vmem>>, vector<8x128xf32>
    %17 = arith.truncf %16 : vector<8x128xf32> to vector<8x128xbf16>
    %18 = arith.truncf %2 : vector<8x128xf32> to vector<8x128xbf16>
    %19 = tpu.concatenate %17, %18 in 1 : vector<8x128xbf16>, vector<8x128xbf16> -> vector<8x256xbf16>
    %c0_14 = arith.constant 0 : index
    %c0_15 = arith.constant 0 : index
    %20 = vector.load %arg3[%c0_14, %c0_15] : memref<256x512xbf16, #tpu.memory_space<vmem>>, vector<256x512xbf16>
    %cst_16 = arith.constant dense<0.000000e+00> : vector<8x512xf32>
    %21 = tpu.matmul %19, %20, %cst_16 {dimension_numbers = #tpu.dot_dimension_numbers<[1], [0], [0], [1], [0, 0, 1, 1], [], []>} : vector<8x256xbf16>, vector<256x512xbf16>, vector<8x512xf32> -> vector<8x512xf32>
    %c0_17 = arith.constant 0 : index
    %c0_18 = arith.constant 0 : index
    %22 = vector.load %arg4[%c0_17, %c0_18] : memref<1x512xf32, #tpu.memory_space<vmem>>, vector<1x512xf32>
    %23 = vector.broadcast %22 : vector<1x512xf32> to vector<8x512xf32>
    %24 = arith.addf %21, %23 : vector<8x512xf32>
    %25 = vector.extract_strided_slice %24 {offsets = [0, 0], sizes = [8, 128], strides = [1, 1]} : vector<8x512xf32> to vector<8x128xf32>
    %26 = arith.negf %25 : vector<8x128xf32>
    %27 = math.exp %26 : vector<8x128xf32>
    %cst_19 = arith.constant 1.000000e+00 : f32
    %28 = vector.broadcast %cst_19 : f32 to vector<8x128xf32>
    %29 = arith.addf %28, %27 : vector<8x128xf32>
    %30 = arith.divf %28, %29 : vector<8x128xf32>
    %31 = vector.extract_strided_slice %24 {offsets = [0, 128], sizes = [8, 128], strides = [1, 1]} : vector<8x512xf32> to vector<8x128xf32>
    %32 = arith.negf %31 : vector<8x128xf32>
    %33 = math.exp %32 : vector<8x128xf32>
    %cst_20 = arith.constant 1.000000e+00 : f32
    %34 = vector.broadcast %cst_20 : f32 to vector<8x128xf32>
    %35 = arith.addf %34, %33 : vector<8x128xf32>
    %36 = arith.divf %34, %35 : vector<8x128xf32>
    %37 = vector.extract_strided_slice %24 {offsets = [0, 256], sizes = [8, 128], strides = [1, 1]} : vector<8x512xf32> to vector<8x128xf32>
    %38 = math.tanh %37 : vector<8x128xf32>
    %39 = vector.extract_strided_slice %24 {offsets = [0, 384], sizes = [8, 128], strides = [1, 1]} : vector<8x512xf32> to vector<8x128xf32>
    %40 = arith.negf %39 : vector<8x128xf32>
    %41 = math.exp %40 : vector<8x128xf32>
    %cst_21 = arith.constant 1.000000e+00 : f32
    %42 = vector.broadcast %cst_21 : f32 to vector<8x128xf32>
    %43 = arith.addf %42, %41 : vector<8x128xf32>
    %44 = arith.divf %42, %43 : vector<8x128xf32>
    %45 = arith.mulf %36, %3 : vector<8x128xf32>
    %46 = arith.mulf %30, %38 : vector<8x128xf32>
    %47 = arith.addf %45, %46 : vector<8x128xf32>
    %48 = math.tanh %47 : vector<8x128xf32>
    %49 = arith.mulf %44, %48 : vector<8x128xf32>
    %c1_i32 = arith.constant 1 : i32
    %50 = arith.index_cast %c1_i32 : i32 to index
    %c0_22 = arith.constant 0 : index
    %51 = memref.load %arg1[%50, %c0_22] : memref<8x2xi32, #tpu.memory_space<smem>>
    %52 = arith.index_cast %51 : i32 to index
    %c0_23 = arith.constant 0 : index
    %c0_24 = arith.constant 0 : index
    %53 = vector.load %arg2[%52, %c0_23, %c0_24] : memref<50x1x128xf32, #tpu.memory_space<vmem>>, vector<1x1x128xf32>
    %54 = vector.shape_cast %53 : vector<1x1x128xf32> to vector<1x128xf32>
    %c0_25 = arith.constant 0 : index
    %c0_26 = arith.constant 0 : index
    %55 = vector.load %arg8[%c0_25, %c0_26] : memref<8x128xf32, #tpu.memory_space<vmem>>, vector<1x128xf32>
    tpu.vector_store %arg8[%c0_25, %c0_26], %54 {strides = array<i32>} : memref<8x128xf32, #tpu.memory_space<vmem>>, vector<1x128xf32>,
    %56 = arith.index_cast %c1_i32 : i32 to index
    %c1_27 = arith.constant 1 : index
    %57 = memref.load %arg1[%56, %c1_27] : memref<8x2xi32, #tpu.memory_space<smem>>
    %58 = arith.index_cast %57 : i32 to index
    %c0_28 = arith.constant 0 : index
    %c0_29 = arith.constant 0 : index
    %59 = vector.load %arg2[%58, %c0_28, %c0_29] : memref<50x1x128xf32, #tpu.memory_space<vmem>>, vector<1x1x128xf32>
    %60 = vector.shape_cast %59 : vector<1x1x128xf32> to vector<1x128xf32>
    %c1_30 = arith.constant 1 : index
    %c0_31 = arith.constant 0 : index
    %61 = vector.load %arg8[%c1_30, %c0_31] : memref<8x128xf32, #tpu.memory_space<vmem>>, vector<1x128xf32>
    tpu.vector_store %arg8[%c1_30, %c0_31], %60 {strides = array<i32>} : memref<8x128xf32, #tpu.memory_space<vmem>>, vector<1x128xf32>,
    %c0_32 = arith.constant 0 : index
    %c0_33 = arith.constant 0 : index
    %62 = vector.load %arg8[%c0_32, %c0_33] : memref<8x128xf32, #tpu.memory_space<vmem>>, vector<8x128xf32>
    %63 = arith.truncf %62 : vector<8x128xf32> to vector<8x128xbf16>
    %64 = arith.truncf %49 : vector<8x128xf32> to vector<8x128xbf16>
    %65 = tpu.concatenate %63, %64 in 1 : vector<8x128xbf16>, vector<8x128xbf16> -> vector<8x256xbf16>
    %c0_34 = arith.constant 0 : index
    %c0_35 = arith.constant 0 : index
    %66 = vector.load %arg3[%c0_34, %c0_35] : memref<256x512xbf16, #tpu.memory_space<vmem>>, vector<256x512xbf16>
    %cst_36 = arith.constant dense<0.000000e+00> : vector<8x512xf32>
    %67 = tpu.matmul %65, %66, %cst_36 {dimension_numbers = #tpu.dot_dimension_numbers<[1], [0], [0], [1], [0, 0, 1, 1], [], []>} : vector<8x256xbf16>, vector<256x512xbf16>, vector<8x512xf32> -> vector<8x512xf32>
    %c0_37 = arith.constant 0 : index
    %c0_38 = arith.constant 0 : index
    %68 = vector.load %arg4[%c0_37, %c0_38] : memref<1x512xf32, #tpu.memory_space<vmem>>, vector<1x512xf32>
    %69 = vector.broadcast %68 : vector<1x512xf32> to vector<8x512xf32>
    %70 = arith.addf %67, %69 : vector<8x512xf32>
    %71 = vector.extract_strided_slice %70 {offsets = [0, 0], sizes = [8, 128], strides = [1, 1]} : vector<8x512xf32> to vector<8x128xf32>
    %72 = arith.negf %71 : vector<8x128xf32>
    %73 = math.exp %72 : vector<8x128xf32>
    %cst_39 = arith.constant 1.000000e+00 : f32
    %74 = vector.broadcast %cst_39 : f32 to vector<8x128xf32>
    %75 = arith.addf %74, %73 : vector<8x128xf32>
    %76 = arith.divf %74, %75 : vector<8x128xf32>
    %77 = vector.extract_strided_slice %70 {offsets = [0, 128], sizes = [8, 128], strides = [1, 1]} : vector<8x512xf32> to vector<8x128xf32>
    %78 = arith.negf %77 : vector<8x128xf32>
    %79 = math.exp %78 : vector<8x128xf32>
    %cst_40 = arith.constant 1.000000e+00 : f32
    %80 = vector.broadcast %cst_40 : f32 to vector<8x128xf32>
    %81 = arith.addf %80, %79 : vector<8x128xf32>
    %82 = arith.divf %80, %81 : vector<8x128xf32>
    %83 = vector.extract_strided_slice %70 {offsets = [0, 256], sizes = [8, 128], strides = [1, 1]} : vector<8x512xf32> to vector<8x128xf32>
    %84 = math.tanh %83 : vector<8x128xf32>
    %85 = vector.extract_strided_slice %70 {offsets = [0, 384], sizes = [8, 128], strides = [1, 1]} : vector<8x512xf32> to vector<8x128xf32>
    %86 = arith.negf %85 : vector<8x128xf32>
    %87 = math.exp %86 : vector<8x128xf32>
    %cst_41 = arith.constant 1.000000e+00 : f32
    %88 = vector.broadcast %cst_41 : f32 to vector<8x128xf32>
    %89 = arith.addf %88, %87 : vector<8x128xf32>
    %90 = arith.divf %88, %89 : vector<8x128xf32>
    %91 = arith.mulf %82, %47 : vector<8x128xf32>
    %92 = arith.mulf %76, %84 : vector<8x128xf32>
    %93 = arith.addf %91, %92 : vector<8x128xf32>
    %94 = math.tanh %93 : vector<8x128xf32>
    %95 = arith.mulf %90, %94 : vector<8x128xf32>
    %c2_i32 = arith.constant 2 : i32
    %96 = arith.index_cast %c2_i32 : i32 to index
    %c0_42 = arith.constant 0 : index
    %97 = memref.load %arg1[%96, %c0_42] : memref<8x2xi32, #tpu.memory_space<smem>>
    %98 = arith.index_cast %97 : i32 to index
    %c0_43 = arith.constant 0 : index
    %c0_44 = arith.constant 0 : index
    %99 = vector.load %arg2[%98, %c0_43, %c0_44] : memref<50x1x128xf32, #tpu.memory_space<vmem>>, vector<1x1x128xf32>
    %100 = vector.shape_cast %99 : vector<1x1x128xf32> to vector<1x128xf32>
    %c0_45 = arith.constant 0 : index
    %c0_46 = arith.constant 0 : index
    %101 = vector.load %arg8[%c0_45, %c0_46] : memref<8x128xf32, #tpu.memory_space<vmem>>, vector<1x128xf32>
    tpu.vector_store %arg8[%c0_45, %c0_46], %100 {strides = array<i32>} : memref<8x128xf32, #tpu.memory_space<vmem>>, vector<1x128xf32>,
    %102 = arith.index_cast %c2_i32 : i32 to index
    %c1_47 = arith.constant 1 : index
    %103 = memref.load %arg1[%102, %c1_47] : memref<8x2xi32, #tpu.memory_space<smem>>
    %104 = arith.index_cast %103 : i32 to index
    %c0_48 = arith.constant 0 : index
    %c0_49 = arith.constant 0 : index
    %105 = vector.load %arg2[%104, %c0_48, %c0_49] : memref<50x1x128xf32, #tpu.memory_space<vmem>>, vector<1x1x128xf32>
    %106 = vector.shape_cast %105 : vector<1x1x128xf32> to vector<1x128xf32>
    %c1_50 = arith.constant 1 : index
    %c0_51 = arith.constant 0 : index
    %107 = vector.load %arg8[%c1_50, %c0_51] : memref<8x128xf32, #tpu.memory_space<vmem>>, vector<1x128xf32>
    tpu.vector_store %arg8[%c1_50, %c0_51], %106 {strides = array<i32>} : memref<8x128xf32, #tpu.memory_space<vmem>>, vector<1x128xf32>,
    %c0_52 = arith.constant 0 : index
    %c0_53 = arith.constant 0 : index
    %108 = vector.load %arg8[%c0_52, %c0_53] : memref<8x128xf32, #tpu.memory_space<vmem>>, vector<8x128xf32>
    %109 = arith.truncf %108 : vector<8x128xf32> to vector<8x128xbf16>
    %110 = arith.truncf %95 : vector<8x128xf32> to vector<8x128xbf16>
    %111 = tpu.concatenate %109, %110 in 1 : vector<8x128xbf16>, vector<8x128xbf16> -> vector<8x256xbf16>
    %c0_54 = arith.constant 0 : index
    %c0_55 = arith.constant 0 : index
    %112 = vector.load %arg3[%c0_54, %c0_55] : memref<256x512xbf16, #tpu.memory_space<vmem>>, vector<256x512xbf16>
    %cst_56 = arith.constant dense<0.000000e+00> : vector<8x512xf32>
    %113 = tpu.matmul %111, %112, %cst_56 {dimension_numbers = #tpu.dot_dimension_numbers<[1], [0], [0], [1], [0, 0, 1, 1], [], []>} : vector<8x256xbf16>, vector<256x512xbf16>, vector<8x512xf32> -> vector<8x512xf32>
    %c0_57 = arith.constant 0 : index
    %c0_58 = arith.constant 0 : index
    %114 = vector.load %arg4[%c0_57, %c0_58] : memref<1x512xf32, #tpu.memory_space<vmem>>, vector<1x512xf32>
    %115 = vector.broadcast %114 : vector<1x512xf32> to vector<8x512xf32>
    %116 = arith.addf %113, %115 : vector<8x512xf32>
    %117 = vector.extract_strided_slice %116 {offsets = [0, 0], sizes = [8, 128], strides = [1, 1]} : vector<8x512xf32> to vector<8x128xf32>
    %118 = arith.negf %117 : vector<8x128xf32>
    %119 = math.exp %118 : vector<8x128xf32>
    %cst_59 = arith.constant 1.000000e+00 : f32
    %120 = vector.broadcast %cst_59 : f32 to vector<8x128xf32>
    %121 = arith.addf %120, %119 : vector<8x128xf32>
    %122 = arith.divf %120, %121 : vector<8x128xf32>
    %123 = vector.extract_strided_slice %116 {offsets = [0, 128], sizes = [8, 128], strides = [1, 1]} : vector<8x512xf32> to vector<8x128xf32>
    %124 = arith.negf %123 : vector<8x128xf32>
    %125 = math.exp %124 : vector<8x128xf32>
    %cst_60 = arith.constant 1.000000e+00 : f32
    %126 = vector.broadcast %cst_60 : f32 to vector<8x128xf32>
    %127 = arith.addf %126, %125 : vector<8x128xf32>
    %128 = arith.divf %126, %127 : vector<8x128xf32>
    %129 = vector.extract_strided_slice %116 {offsets = [0, 256], sizes = [8, 128], strides = [1, 1]} : vector<8x512xf32> to vector<8x128xf32>
    %130 = math.tanh %129 : vector<8x128xf32>
    %131 = vector.extract_strided_slice %116 {offsets = [0, 384], sizes = [8, 128], strides = [1, 1]} : vector<8x512xf32> to vector<8x128xf32>
    %132 = arith.negf %131 : vector<8x128xf32>
    %133 = math.exp %132 : vector<8x128xf32>
    %cst_61 = arith.constant 1.000000e+00 : f32
    %134 = vector.broadcast %cst_61 : f32 to vector<8x128xf32>
    %135 = arith.addf %134, %133 : vector<8x128xf32>
    %136 = arith.divf %134, %135 : vector<8x128xf32>
    %137 = arith.mulf %128, %93 : vector<8x128xf32>
    %138 = arith.mulf %122, %130 : vector<8x128xf32>
    %139 = arith.addf %137, %138 : vector<8x128xf32>
    %140 = math.tanh %139 : vector<8x128xf32>
    %141 = arith.mulf %136, %140 : vector<8x128xf32>
    %c3_i32 = arith.constant 3 : i32
    %142 = arith.index_cast %c3_i32 : i32 to index
    %c0_62 = arith.constant 0 : index
    %143 = memref.load %arg1[%142, %c0_62] : memref<8x2xi32, #tpu.memory_space<smem>>
    %144 = arith.index_cast %143 : i32 to index
    %c0_63 = arith.constant 0 : index
    %c0_64 = arith.constant 0 : index
    %145 = vector.load %arg2[%144, %c0_63, %c0_64] : memref<50x1x128xf32, #tpu.memory_space<vmem>>, vector<1x1x128xf32>
    %146 = vector.shape_cast %145 : vector<1x1x128xf32> to vector<1x128xf32>
    %c0_65 = arith.constant 0 : index
    %c0_66 = arith.constant 0 : index
    %147 = vector.load %arg8[%c0_65, %c0_66] : memref<8x128xf32, #tpu.memory_space<vmem>>, vector<1x128xf32>
    tpu.vector_store %arg8[%c0_65, %c0_66], %146 {strides = array<i32>} : memref<8x128xf32, #tpu.memory_space<vmem>>, vector<1x128xf32>,
    %148 = arith.index_cast %c3_i32 : i32 to index
    %c1_67 = arith.constant 1 : index
    %149 = memref.load %arg1[%148, %c1_67] : memref<8x2xi32, #tpu.memory_space<smem>>
    %150 = arith.index_cast %149 : i32 to index
    %c0_68 = arith.constant 0 : index
    %c0_69 = arith.constant 0 : index
    %151 = vector.load %arg2[%150, %c0_68, %c0_69] : memref<50x1x128xf32, #tpu.memory_space<vmem>>, vector<1x1x128xf32>
    %152 = vector.shape_cast %151 : vector<1x1x128xf32> to vector<1x128xf32>
    %c1_70 = arith.constant 1 : index
    %c0_71 = arith.constant 0 : index
    %153 = vector.load %arg8[%c1_70, %c0_71] : memref<8x128xf32, #tpu.memory_space<vmem>>, vector<1x128xf32>
    tpu.vector_store %arg8[%c1_70, %c0_71], %152 {strides = array<i32>} : memref<8x128xf32, #tpu.memory_space<vmem>>, vector<1x128xf32>,
    %c0_72 = arith.constant 0 : index
    %c0_73 = arith.constant 0 : index
    %154 = vector.load %arg8[%c0_72, %c0_73] : memref<8x128xf32, #tpu.memory_space<vmem>>, vector<8x128xf32>
    %155 = arith.truncf %154 : vector<8x128xf32> to vector<8x128xbf16>
    %156 = arith.truncf %141 : vector<8x128xf32> to vector<8x128xbf16>
    %157 = tpu.concatenate %155, %156 in 1 : vector<8x128xbf16>, vector<8x128xbf16> -> vector<8x256xbf16>
    %c0_74 = arith.constant 0 : index
    %c0_75 = arith.constant 0 : index
    %158 = vector.load %arg3[%c0_74, %c0_75] : memref<256x512xbf16, #tpu.memory_space<vmem>>, vector<256x512xbf16>
    %cst_76 = arith.constant dense<0.000000e+00> : vector<8x512xf32>
    %159 = tpu.matmul %157, %158, %cst_76 {dimension_numbers = #tpu.dot_dimension_numbers<[1], [0], [0], [1], [0, 0, 1, 1], [], []>} : vector<8x256xbf16>, vector<256x512xbf16>, vector<8x512xf32> -> vector<8x512xf32>
    %c0_77 = arith.constant 0 : index
    %c0_78 = arith.constant 0 : index
    %160 = vector.load %arg4[%c0_77, %c0_78] : memref<1x512xf32, #tpu.memory_space<vmem>>, vector<1x512xf32>
    %161 = vector.broadcast %160 : vector<1x512xf32> to vector<8x512xf32>
    %162 = arith.addf %159, %161 : vector<8x512xf32>
    %163 = vector.extract_strided_slice %162 {offsets = [0, 0], sizes = [8, 128], strides = [1, 1]} : vector<8x512xf32> to vector<8x128xf32>
    %164 = arith.negf %163 : vector<8x128xf32>
    %165 = math.exp %164 : vector<8x128xf32>
    %cst_79 = arith.constant 1.000000e+00 : f32
    %166 = vector.broadcast %cst_79 : f32 to vector<8x128xf32>
    %167 = arith.addf %166, %165 : vector<8x128xf32>
    %168 = arith.divf %166, %167 : vector<8x128xf32>
    %169 = vector.extract_strided_slice %162 {offsets = [0, 128], sizes = [8, 128], strides = [1, 1]} : vector<8x512xf32> to vector<8x128xf32>
    %170 = arith.negf %169 : vector<8x128xf32>
    %171 = math.exp %170 : vector<8x128xf32>
    %cst_80 = arith.constant 1.000000e+00 : f32
    %172 = vector.broadcast %cst_80 : f32 to vector<8x128xf32>
    %173 = arith.addf %172, %171 : vector<8x128xf32>
    %174 = arith.divf %172, %173 : vector<8x128xf32>
    %175 = vector.extract_strided_slice %162 {offsets = [0, 256], sizes = [8, 128], strides = [1, 1]} : vector<8x512xf32> to vector<8x128xf32>
    %176 = math.tanh %175 : vector<8x128xf32>
    %177 = vector.extract_strided_slice %162 {offsets = [0, 384], sizes = [8, 128], strides = [1, 1]} : vector<8x512xf32> to vector<8x128xf32>
    %178 = arith.negf %177 : vector<8x128xf32>
    %179 = math.exp %178 : vector<8x128xf32>
    %cst_81 = arith.constant 1.000000e+00 : f32
    %180 = vector.broadcast %cst_81 : f32 to vector<8x128xf32>
    %181 = arith.addf %180, %179 : vector<8x128xf32>
    %182 = arith.divf %180, %181 : vector<8x128xf32>
    %183 = arith.mulf %174, %139 : vector<8x128xf32>
    %184 = arith.mulf %168, %176 : vector<8x128xf32>
    %185 = arith.addf %183, %184 : vector<8x128xf32>
    %186 = math.tanh %185 : vector<8x128xf32>
    %187 = arith.mulf %182, %186 : vector<8x128xf32>
    %c4_i32 = arith.constant 4 : i32
    %188 = arith.index_cast %c4_i32 : i32 to index
    %c0_82 = arith.constant 0 : index
    %189 = memref.load %arg1[%188, %c0_82] : memref<8x2xi32, #tpu.memory_space<smem>>
    %190 = arith.index_cast %189 : i32 to index
    %c0_83 = arith.constant 0 : index
    %c0_84 = arith.constant 0 : index
    %191 = vector.load %arg2[%190, %c0_83, %c0_84] : memref<50x1x128xf32, #tpu.memory_space<vmem>>, vector<1x1x128xf32>
    %192 = vector.shape_cast %191 : vector<1x1x128xf32> to vector<1x128xf32>
    %c0_85 = arith.constant 0 : index
    %c0_86 = arith.constant 0 : index
    %193 = vector.load %arg8[%c0_85, %c0_86] : memref<8x128xf32, #tpu.memory_space<vmem>>, vector<1x128xf32>
    tpu.vector_store %arg8[%c0_85, %c0_86], %192 {strides = array<i32>} : memref<8x128xf32, #tpu.memory_space<vmem>>, vector<1x128xf32>,
    %194 = arith.index_cast %c4_i32 : i32 to index
    %c1_87 = arith.constant 1 : index
    %195 = memref.load %arg1[%194, %c1_87] : memref<8x2xi32, #tpu.memory_space<smem>>
    %196 = arith.index_cast %195 : i32 to index
    %c0_88 = arith.constant 0 : index
    %c0_89 = arith.constant 0 : index
    %197 = vector.load %arg2[%196, %c0_88, %c0_89] : memref<50x1x128xf32, #tpu.memory_space<vmem>>, vector<1x1x128xf32>
    %198 = vector.shape_cast %197 : vector<1x1x128xf32> to vector<1x128xf32>
    %c1_90 = arith.constant 1 : index
    %c0_91 = arith.constant 0 : index
    %199 = vector.load %arg8[%c1_90, %c0_91] : memref<8x128xf32, #tpu.memory_space<vmem>>, vector<1x128xf32>
    tpu.vector_store %arg8[%c1_90, %c0_91], %198 {strides = array<i32>} : memref<8x128xf32, #tpu.memory_space<vmem>>, vector<1x128xf32>,
    %c0_92 = arith.constant 0 : index
    %c0_93 = arith.constant 0 : index
    %200 = vector.load %arg8[%c0_92, %c0_93] : memref<8x128xf32, #tpu.memory_space<vmem>>, vector<8x128xf32>
    %201 = arith.truncf %200 : vector<8x128xf32> to vector<8x128xbf16>
    %202 = arith.truncf %187 : vector<8x128xf32> to vector<8x128xbf16>
    %203 = tpu.concatenate %201, %202 in 1 : vector<8x128xbf16>, vector<8x128xbf16> -> vector<8x256xbf16>
    %c0_94 = arith.constant 0 : index
    %c0_95 = arith.constant 0 : index
    %204 = vector.load %arg3[%c0_94, %c0_95] : memref<256x512xbf16, #tpu.memory_space<vmem>>, vector<256x512xbf16>
    %cst_96 = arith.constant dense<0.000000e+00> : vector<8x512xf32>
    %205 = tpu.matmul %203, %204, %cst_96 {dimension_numbers = #tpu.dot_dimension_numbers<[1], [0], [0], [1], [0, 0, 1, 1], [], []>} : vector<8x256xbf16>, vector<256x512xbf16>, vector<8x512xf32> -> vector<8x512xf32>
    %c0_97 = arith.constant 0 : index
    %c0_98 = arith.constant 0 : index
    %206 = vector.load %arg4[%c0_97, %c0_98] : memref<1x512xf32, #tpu.memory_space<vmem>>, vector<1x512xf32>
    %207 = vector.broadcast %206 : vector<1x512xf32> to vector<8x512xf32>
    %208 = arith.addf %205, %207 : vector<8x512xf32>
    %209 = vector.extract_strided_slice %208 {offsets = [0, 0], sizes = [8, 128], strides = [1, 1]} : vector<8x512xf32> to vector<8x128xf32>
    %210 = arith.negf %209 : vector<8x128xf32>
    %211 = math.exp %210 : vector<8x128xf32>
    %cst_99 = arith.constant 1.000000e+00 : f32
    %212 = vector.broadcast %cst_99 : f32 to vector<8x128xf32>
    %213 = arith.addf %212, %211 : vector<8x128xf32>
    %214 = arith.divf %212, %213 : vector<8x128xf32>
    %215 = vector.extract_strided_slice %208 {offsets = [0, 128], sizes = [8, 128], strides = [1, 1]} : vector<8x512xf32> to vector<8x128xf32>
    %216 = arith.negf %215 : vector<8x128xf32>
    %217 = math.exp %216 : vector<8x128xf32>
    %cst_100 = arith.constant 1.000000e+00 : f32
    %218 = vector.broadcast %cst_100 : f32 to vector<8x128xf32>
    %219 = arith.addf %218, %217 : vector<8x128xf32>
    %220 = arith.divf %218, %219 : vector<8x128xf32>
    %221 = vector.extract_strided_slice %208 {offsets = [0, 256], sizes = [8, 128], strides = [1, 1]} : vector<8x512xf32> to vector<8x128xf32>
    %222 = math.tanh %221 : vector<8x128xf32>
    %223 = vector.extract_strided_slice %208 {offsets = [0, 384], sizes = [8, 128], strides = [1, 1]} : vector<8x512xf32> to vector<8x128xf32>
    %224 = arith.negf %223 : vector<8x128xf32>
    %225 = math.exp %224 : vector<8x128xf32>
    %cst_101 = arith.constant 1.000000e+00 : f32
    %226 = vector.broadcast %cst_101 : f32 to vector<8x128xf32>
    %227 = arith.addf %226, %225 : vector<8x128xf32>
    %228 = arith.divf %226, %227 : vector<8x128xf32>
    %229 = arith.mulf %220, %185 : vector<8x128xf32>
    %230 = arith.mulf %214, %222 : vector<8x128xf32>
    %231 = arith.addf %229, %230 : vector<8x128xf32>
    %232 = math.tanh %231 : vector<8x128xf32>
    %233 = arith.mulf %228, %232 : vector<8x128xf32>
    %c5_i32 = arith.constant 5 : i32
    %234 = arith.index_cast %c5_i32 : i32 to index
    %c0_102 = arith.constant 0 : index
    %235 = memref.load %arg1[%234, %c0_102] : memref<8x2xi32, #tpu.memory_space<smem>>
    %236 = arith.index_cast %235 : i32 to index
    %c0_103 = arith.constant 0 : index
    %c0_104 = arith.constant 0 : index
    %237 = vector.load %arg2[%236, %c0_103, %c0_104] : memref<50x1x128xf32, #tpu.memory_space<vmem>>, vector<1x1x128xf32>
    %238 = vector.shape_cast %237 : vector<1x1x128xf32> to vector<1x128xf32>
    %c0_105 = arith.constant 0 : index
    %c0_106 = arith.constant 0 : index
    %239 = vector.load %arg8[%c0_105, %c0_106] : memref<8x128xf32, #tpu.memory_space<vmem>>, vector<1x128xf32>
    tpu.vector_store %arg8[%c0_105, %c0_106], %238 {strides = array<i32>} : memref<8x128xf32, #tpu.memory_space<vmem>>, vector<1x128xf32>,
    %240 = arith.index_cast %c5_i32 : i32 to index
    %c1_107 = arith.constant 1 : index
    %241 = memref.load %arg1[%240, %c1_107] : memref<8x2xi32, #tpu.memory_space<smem>>
    %242 = arith.index_cast %241 : i32 to index
    %c0_108 = arith.constant 0 : index
    %c0_109 = arith.constant 0 : index
    %243 = vector.load %arg2[%242, %c0_108, %c0_109] : memref<50x1x128xf32, #tpu.memory_space<vmem>>, vector<1x1x128xf32>
    %244 = vector.shape_cast %243 : vector<1x1x128xf32> to vector<1x128xf32>
    %c1_110 = arith.constant 1 : index
    %c0_111 = arith.constant 0 : index
    %245 = vector.load %arg8[%c1_110, %c0_111] : memref<8x128xf32, #tpu.memory_space<vmem>>, vector<1x128xf32>
    tpu.vector_store %arg8[%c1_110, %c0_111], %244 {strides = array<i32>} : memref<8x128xf32, #tpu.memory_space<vmem>>, vector<1x128xf32>,
    %c0_112 = arith.constant 0 : index
    %c0_113 = arith.constant 0 : index
    %246 = vector.load %arg8[%c0_112, %c0_113] : memref<8x128xf32, #tpu.memory_space<vmem>>, vector<8x128xf32>
    %247 = arith.truncf %246 : vector<8x128xf32> to vector<8x128xbf16>
    %248 = arith.truncf %233 : vector<8x128xf32> to vector<8x128xbf16>
    %249 = tpu.concatenate %247, %248 in 1 : vector<8x128xbf16>, vector<8x128xbf16> -> vector<8x256xbf16>
    %c0_114 = arith.constant 0 : index
    %c0_115 = arith.constant 0 : index
    %250 = vector.load %arg3[%c0_114, %c0_115] : memref<256x512xbf16, #tpu.memory_space<vmem>>, vector<256x512xbf16>
    %cst_116 = arith.constant dense<0.000000e+00> : vector<8x512xf32>
    %251 = tpu.matmul %249, %250, %cst_116 {dimension_numbers = #tpu.dot_dimension_numbers<[1], [0], [0], [1], [0, 0, 1, 1], [], []>} : vector<8x256xbf16>, vector<256x512xbf16>, vector<8x512xf32> -> vector<8x512xf32>
    %c0_117 = arith.constant 0 : index
    %c0_118 = arith.constant 0 : index
    %252 = vector.load %arg4[%c0_117, %c0_118] : memref<1x512xf32, #tpu.memory_space<vmem>>, vector<1x512xf32>
    %253 = vector.broadcast %252 : vector<1x512xf32> to vector<8x512xf32>
    %254 = arith.addf %251, %253 : vector<8x512xf32>
    %255 = vector.extract_strided_slice %254 {offsets = [0, 0], sizes = [8, 128], strides = [1, 1]} : vector<8x512xf32> to vector<8x128xf32>
    %256 = arith.negf %255 : vector<8x128xf32>
    %257 = math.exp %256 : vector<8x128xf32>
    %cst_119 = arith.constant 1.000000e+00 : f32
    %258 = vector.broadcast %cst_119 : f32 to vector<8x128xf32>
    %259 = arith.addf %258, %257 : vector<8x128xf32>
    %260 = arith.divf %258, %259 : vector<8x128xf32>
    %261 = vector.extract_strided_slice %254 {offsets = [0, 128], sizes = [8, 128], strides = [1, 1]} : vector<8x512xf32> to vector<8x128xf32>
    %262 = arith.negf %261 : vector<8x128xf32>
    %263 = math.exp %262 : vector<8x128xf32>
    %cst_120 = arith.constant 1.000000e+00 : f32
    %264 = vector.broadcast %cst_120 : f32 to vector<8x128xf32>
    %265 = arith.addf %264, %263 : vector<8x128xf32>
    %266 = arith.divf %264, %265 : vector<8x128xf32>
    %267 = vector.extract_strided_slice %254 {offsets = [0, 256], sizes = [8, 128], strides = [1, 1]} : vector<8x512xf32> to vector<8x128xf32>
    %268 = math.tanh %267 : vector<8x128xf32>
    %269 = vector.extract_strided_slice %254 {offsets = [0, 384], sizes = [8, 128], strides = [1, 1]} : vector<8x512xf32> to vector<8x128xf32>
    %270 = arith.negf %269 : vector<8x128xf32>
    %271 = math.exp %270 : vector<8x128xf32>
    %cst_121 = arith.constant 1.000000e+00 : f32
    %272 = vector.broadcast %cst_121 : f32 to vector<8x128xf32>
    %273 = arith.addf %272, %271 : vector<8x128xf32>
    %274 = arith.divf %272, %273 : vector<8x128xf32>
    %275 = arith.mulf %266, %231 : vector<8x128xf32>
    %276 = arith.mulf %260, %268 : vector<8x128xf32>
    %277 = arith.addf %275, %276 : vector<8x128xf32>
    %278 = math.tanh %277 : vector<8x128xf32>
    %279 = arith.mulf %274, %278 : vector<8x128xf32>
    %c6_i32 = arith.constant 6 : i32
    %280 = arith.index_cast %c6_i32 : i32 to index
    %c0_122 = arith.constant 0 : index
    %281 = memref.load %arg1[%280, %c0_122] : memref<8x2xi32, #tpu.memory_space<smem>>
    %282 = arith.index_cast %281 : i32 to index
    %c0_123 = arith.constant 0 : index
    %c0_124 = arith.constant 0 : index
    %283 = vector.load %arg2[%282, %c0_123, %c0_124] : memref<50x1x128xf32, #tpu.memory_space<vmem>>, vector<1x1x128xf32>
    %284 = vector.shape_cast %283 : vector<1x1x128xf32> to vector<1x128xf32>
    %c0_125 = arith.constant 0 : index
    %c0_126 = arith.constant 0 : index
    %285 = vector.load %arg8[%c0_125, %c0_126] : memref<8x128xf32, #tpu.memory_space<vmem>>, vector<1x128xf32>
    tpu.vector_store %arg8[%c0_125, %c0_126], %284 {strides = array<i32>} : memref<8x128xf32, #tpu.memory_space<vmem>>, vector<1x128xf32>,
    %286 = arith.index_cast %c6_i32 : i32 to index
    %c1_127 = arith.constant 1 : index
    %287 = memref.load %arg1[%286, %c1_127] : memref<8x2xi32, #tpu.memory_space<smem>>
    %288 = arith.index_cast %287 : i32 to index
    %c0_128 = arith.constant 0 : index
    %c0_129 = arith.constant 0 : index
    %289 = vector.load %arg2[%288, %c0_128, %c0_129] : memref<50x1x128xf32, #tpu.memory_space<vmem>>, vector<1x1x128xf32>
    %290 = vector.shape_cast %289 : vector<1x1x128xf32> to vector<1x128xf32>
    %c1_130 = arith.constant 1 : index
    %c0_131 = arith.constant 0 : index
    %291 = vector.load %arg8[%c1_130, %c0_131] : memref<8x128xf32, #tpu.memory_space<vmem>>, vector<1x128xf32>
    tpu.vector_store %arg8[%c1_130, %c0_131], %290 {strides = array<i32>} : memref<8x128xf32, #tpu.memory_space<vmem>>, vector<1x128xf32>,
    %c0_132 = arith.constant 0 : index
    %c0_133 = arith.constant 0 : index
    %292 = vector.load %arg8[%c0_132, %c0_133] : memref<8x128xf32, #tpu.memory_space<vmem>>, vector<8x128xf32>
    %293 = arith.truncf %292 : vector<8x128xf32> to vector<8x128xbf16>
    %294 = arith.truncf %279 : vector<8x128xf32> to vector<8x128xbf16>
    %295 = tpu.concatenate %293, %294 in 1 : vector<8x128xbf16>, vector<8x128xbf16> -> vector<8x256xbf16>
    %c0_134 = arith.constant 0 : index
    %c0_135 = arith.constant 0 : index
    %296 = vector.load %arg3[%c0_134, %c0_135] : memref<256x512xbf16, #tpu.memory_space<vmem>>, vector<256x512xbf16>
    %cst_136 = arith.constant dense<0.000000e+00> : vector<8x512xf32>
    %297 = tpu.matmul %295, %296, %cst_136 {dimension_numbers = #tpu.dot_dimension_numbers<[1], [0], [0], [1], [0, 0, 1, 1], [], []>} : vector<8x256xbf16>, vector<256x512xbf16>, vector<8x512xf32> -> vector<8x512xf32>
    %c0_137 = arith.constant 0 : index
    %c0_138 = arith.constant 0 : index
    %298 = vector.load %arg4[%c0_137, %c0_138] : memref<1x512xf32, #tpu.memory_space<vmem>>, vector<1x512xf32>
    %299 = vector.broadcast %298 : vector<1x512xf32> to vector<8x512xf32>
    %300 = arith.addf %297, %299 : vector<8x512xf32>
    %301 = vector.extract_strided_slice %300 {offsets = [0, 0], sizes = [8, 128], strides = [1, 1]} : vector<8x512xf32> to vector<8x128xf32>
    %302 = arith.negf %301 : vector<8x128xf32>
    %303 = math.exp %302 : vector<8x128xf32>
    %cst_139 = arith.constant 1.000000e+00 : f32
    %304 = vector.broadcast %cst_139 : f32 to vector<8x128xf32>
    %305 = arith.addf %304, %303 : vector<8x128xf32>
    %306 = arith.divf %304, %305 : vector<8x128xf32>
    %307 = vector.extract_strided_slice %300 {offsets = [0, 128], sizes = [8, 128], strides = [1, 1]} : vector<8x512xf32> to vector<8x128xf32>
    %308 = arith.negf %307 : vector<8x128xf32>
    %309 = math.exp %308 : vector<8x128xf32>
    %cst_140 = arith.constant 1.000000e+00 : f32
    %310 = vector.broadcast %cst_140 : f32 to vector<8x128xf32>
    %311 = arith.addf %310, %309 : vector<8x128xf32>
    %312 = arith.divf %310, %311 : vector<8x128xf32>
    %313 = vector.extract_strided_slice %300 {offsets = [0, 256], sizes = [8, 128], strides = [1, 1]} : vector<8x512xf32> to vector<8x128xf32>
    %314 = math.tanh %313 : vector<8x128xf32>
    %315 = vector.extract_strided_slice %300 {offsets = [0, 384], sizes = [8, 128], strides = [1, 1]} : vector<8x512xf32> to vector<8x128xf32>
    %316 = arith.negf %315 : vector<8x128xf32>
    %317 = math.exp %316 : vector<8x128xf32>
    %cst_141 = arith.constant 1.000000e+00 : f32
    %318 = vector.broadcast %cst_141 : f32 to vector<8x128xf32>
    %319 = arith.addf %318, %317 : vector<8x128xf32>
    %320 = arith.divf %318, %319 : vector<8x128xf32>
    %321 = arith.mulf %312, %277 : vector<8x128xf32>
    %322 = arith.mulf %306, %314 : vector<8x128xf32>
    %323 = arith.addf %321, %322 : vector<8x128xf32>
    %324 = math.tanh %323 : vector<8x128xf32>
    %325 = arith.mulf %320, %324 : vector<8x128xf32>
    %c7_i32 = arith.constant 7 : i32
    %326 = arith.index_cast %c7_i32 : i32 to index
    %c0_142 = arith.constant 0 : index
    %327 = memref.load %arg1[%326, %c0_142] : memref<8x2xi32, #tpu.memory_space<smem>>
    %328 = arith.index_cast %327 : i32 to index
    %c0_143 = arith.constant 0 : index
    %c0_144 = arith.constant 0 : index
    %329 = vector.load %arg2[%328, %c0_143, %c0_144] : memref<50x1x128xf32, #tpu.memory_space<vmem>>, vector<1x1x128xf32>
    %330 = vector.shape_cast %329 : vector<1x1x128xf32> to vector<1x128xf32>
    %c0_145 = arith.constant 0 : index
    %c0_146 = arith.constant 0 : index
    %331 = vector.load %arg8[%c0_145, %c0_146] : memref<8x128xf32, #tpu.memory_space<vmem>>, vector<1x128xf32>
    tpu.vector_store %arg8[%c0_145, %c0_146], %330 {strides = array<i32>} : memref<8x128xf32, #tpu.memory_space<vmem>>, vector<1x128xf32>,
    %332 = arith.index_cast %c7_i32 : i32 to index
    %c1_147 = arith.constant 1 : index
    %333 = memref.load %arg1[%332, %c1_147] : memref<8x2xi32, #tpu.memory_space<smem>>
    %334 = arith.index_cast %333 : i32 to index
    %c0_148 = arith.constant 0 : index
    %c0_149 = arith.constant 0 : index
    %335 = vector.load %arg2[%334, %c0_148, %c0_149] : memref<50x1x128xf32, #tpu.memory_space<vmem>>, vector<1x1x128xf32>
    %336 = vector.shape_cast %335 : vector<1x1x128xf32> to vector<1x128xf32>
    %c1_150 = arith.constant 1 : index
    %c0_151 = arith.constant 0 : index
    %337 = vector.load %arg8[%c1_150, %c0_151] : memref<8x128xf32, #tpu.memory_space<vmem>>, vector<1x128xf32>
    tpu.vector_store %arg8[%c1_150, %c0_151], %336 {strides = array<i32>} : memref<8x128xf32, #tpu.memory_space<vmem>>, vector<1x128xf32>,
    %c0_152 = arith.constant 0 : index
    %c0_153 = arith.constant 0 : index
    %338 = vector.load %arg8[%c0_152, %c0_153] : memref<8x128xf32, #tpu.memory_space<vmem>>, vector<8x128xf32>
    %339 = arith.truncf %338 : vector<8x128xf32> to vector<8x128xbf16>
    %340 = arith.truncf %325 : vector<8x128xf32> to vector<8x128xbf16>
    %341 = tpu.concatenate %339, %340 in 1 : vector<8x128xbf16>, vector<8x128xbf16> -> vector<8x256xbf16>
    %c0_154 = arith.constant 0 : index
    %c0_155 = arith.constant 0 : index
    %342 = vector.load %arg3[%c0_154, %c0_155] : memref<256x512xbf16, #tpu.memory_space<vmem>>, vector<256x512xbf16>
    %cst_156 = arith.constant dense<0.000000e+00> : vector<8x512xf32>
    %343 = tpu.matmul %341, %342, %cst_156 {dimension_numbers = #tpu.dot_dimension_numbers<[1], [0], [0], [1], [0, 0, 1, 1], [], []>} : vector<8x256xbf16>, vector<256x512xbf16>, vector<8x512xf32> -> vector<8x512xf32>
    %c0_157 = arith.constant 0 : index
    %c0_158 = arith.constant 0 : index
    %344 = vector.load %arg4[%c0_157, %c0_158] : memref<1x512xf32, #tpu.memory_space<vmem>>, vector<1x512xf32>
    %345 = vector.broadcast %344 : vector<1x512xf32> to vector<8x512xf32>
    %346 = arith.addf %343, %345 : vector<8x512xf32>
    %347 = vector.extract_strided_slice %346 {offsets = [0, 0], sizes = [8, 128], strides = [1, 1]} : vector<8x512xf32> to vector<8x128xf32>
    %348 = arith.negf %347 : vector<8x128xf32>
    %349 = math.exp %348 : vector<8x128xf32>
    %cst_159 = arith.constant 1.000000e+00 : f32
    %350 = vector.broadcast %cst_159 : f32 to vector<8x128xf32>
    %351 = arith.addf %350, %349 : vector<8x128xf32>
    %352 = arith.divf %350, %351 : vector<8x128xf32>
    %353 = vector.extract_strided_slice %346 {offsets = [0, 128], sizes = [8, 128], strides = [1, 1]} : vector<8x512xf32> to vector<8x128xf32>
    %354 = arith.negf %353 : vector<8x128xf32>
    %355 = math.exp %354 : vector<8x128xf32>
    %cst_160 = arith.constant 1.000000e+00 : f32
    %356 = vector.broadcast %cst_160 : f32 to vector<8x128xf32>
    %357 = arith.addf %356, %355 : vector<8x128xf32>
    %358 = arith.divf %356, %357 : vector<8x128xf32>
    %359 = vector.extract_strided_slice %346 {offsets = [0, 256], sizes = [8, 128], strides = [1, 1]} : vector<8x512xf32> to vector<8x128xf32>
    %360 = math.tanh %359 : vector<8x128xf32>
    %361 = vector.extract_strided_slice %346 {offsets = [0, 384], sizes = [8, 128], strides = [1, 1]} : vector<8x512xf32> to vector<8x128xf32>
    %362 = arith.negf %361 : vector<8x128xf32>
    %363 = math.exp %362 : vector<8x128xf32>
    %cst_161 = arith.constant 1.000000e+00 : f32
    %364 = vector.broadcast %cst_161 : f32 to vector<8x128xf32>
    %365 = arith.addf %364, %363 : vector<8x128xf32>
    %366 = arith.divf %364, %365 : vector<8x128xf32>
    %367 = arith.mulf %358, %323 : vector<8x128xf32>
    %368 = arith.mulf %352, %360 : vector<8x128xf32>
    %369 = arith.addf %367, %368 : vector<8x128xf32>
    %370 = math.tanh %369 : vector<8x128xf32>
    %371 = arith.mulf %366, %370 : vector<8x128xf32>
    %c8_i32 = arith.constant 8 : i32
    %372 = arith.truncf %371 : vector<8x128xf32> to vector<8x128xbf16>
    %c0_162 = arith.constant 0 : index
    %c0_163 = arith.constant 0 : index
    %373 = vector.load %arg5[%c0_162, %c0_163] : memref<128x128xbf16, #tpu.memory_space<vmem>>, vector<128x128xbf16>
    %cst_164 = arith.constant dense<0.000000e+00> : vector<8x128xf32>
    %374 = tpu.matmul %372, %373, %cst_164 {dimension_numbers = #tpu.dot_dimension_numbers<[1], [0], [0], [1], [0, 0, 1, 1], [], []>} : vector<8x128xbf16>, vector<128x128xbf16>, vector<8x128xf32> -> vector<8x128xf32>
    %c0_165 = arith.constant 0 : index
    %c0_166 = arith.constant 0 : index
    %375 = vector.load %arg6[%c0_165, %c0_166] : memref<1x128xf32, #tpu.memory_space<vmem>>, vector<1x128xf32>
    %376 = vector.broadcast %375 : vector<1x128xf32> to vector<8x128xf32>
    %377 = arith.addf %374, %376 : vector<8x128xf32>
    %c0_167 = arith.constant 0 : index
    %c0_168 = arith.constant 0 : index
    %378 = vector.load %arg7[%c0_167, %c0_168] : memref<8x128xf32, #tpu.memory_space<vmem>>, vector<8x128xf32>
    tpu.vector_store %arg7[%c0_167, %c0_168], %377 {strides = array<i32>} : memref<8x128xf32, #tpu.memory_space<vmem>>, vector<8x128xf32>,
    return
  }
  func.func @transform_0(%arg0: i32, %arg1: memref<8x2xi32, #tpu.memory_space<smem>>) -> (i32, i32, i32) {
    %c0_i32 = arith.constant 0 : i32
    %c0_i32_0 = arith.constant 0 : i32
    %c0_i32_1 = arith.constant 0 : i32
    %c0_i32_2 = arith.constant 0 : i32
    return %c0_i32, %c0_i32_0, %c0_i32_1 : i32, i32, i32
  }
  func.func @transform_1(%arg0: i32, %arg1: memref<8x2xi32, #tpu.memory_space<smem>>) -> (i32, i32) {
    %c0_i32 = arith.constant 0 : i32
    %c0_i32_0 = arith.constant 0 : i32
    %c0_i32_1 = arith.constant 0 : i32
    return %c0_i32, %c0_i32_0 : i32, i32
  }
  func.func @transform_2(%arg0: i32, %arg1: memref<8x2xi32, #tpu.memory_space<smem>>) -> (i32, i32) {
    %c0_i32 = arith.constant 0 : i32
    %c0_i32_0 = arith.constant 0 : i32
    %c0_i32_1 = arith.constant 0 : i32
    return %c0_i32, %c0_i32_0 : i32, i32
  }
  func.func @transform_3(%arg0: i32, %arg1: memref<8x2xi32, #tpu.memory_space<smem>>) -> (i32, i32) {
    %c0_i32 = arith.constant 0 : i32
    %c0_i32_0 = arith.constant 0 : i32
    %c0_i32_1 = arith.constant 0 : i32
    return %c0_i32, %c0_i32_0 : i32, i32
  }
  func.func @transform_4(%arg0: i32, %arg1: memref<8x2xi32, #tpu.memory_space<smem>>) -> (i32, i32) {
    %c0_i32 = arith.constant 0 : i32
    %c0_i32_0 = arith.constant 0 : i32
    %c0_i32_1 = arith.constant 0 : i32
    return %c0_i32, %c0_i32_0 : i32, i32
  }
  func.func @transform_5(%arg0: i32, %arg1: memref<8x2xi32, #tpu.memory_space<smem>>) -> (i32, i32) {
    %c0_i32 = arith.constant 0 : i32
    %c0_i32_0 = arith.constant 0 : i32
    %c0_i32_1 = arith.constant 0 : i32
    return %c0_i32, %c0_i32_0 : i32, i32
  }
}

</mosaic_0001>

<bundles_post_ra>
// kernel: lstm_classifier_forward.1
= control target key start
LH: loop header
LB: loop body
LE: loop exit
PB: predicated region body
PF: predicated region fallthrough
CT: control target
= control target key end

     0   :  { %s7070_s0 = inlined_call_operand.vmem [shape: s32[8,2], index: 0, kind: input, shape index: {}]   ;;  %s7071_s1 = inlined_call_operand.vmem [shape: f32[50,1,128], index: 1, kind: input, shape index: {}]   ;;  %s7072_s2 = inlined_call_operand.vmem [shape: bf16[256,512], index: 2, kind: input, shape index: {}]   ;;  %s7073_s3 = inlined_call_operand.vmem [shape: f32[1,512], index: 3, kind: input, shape index: {}]   ;;  %s7074_s4 = inlined_call_operand.vmem [shape: bf16[128,128], index: 4, kind: input, shape index: {}]   ;;  %s7075_s5 = inlined_call_operand.vmem [shape: f32[1,128], index: 5, kind: input, shape index: {}]   ;;  %s7076_s6 = inlined_call_operand.vmem [shape: f32[8,128], index: 6, kind: output, shape index: {}]  }
   0x1   :  { %s11_s23 = sshll.u32 %s7070_s0, 4  ;;  %s12_s23 = int_to_ptr.vmem [resolvable:$true] %s11_s23 }
   0x2   :  { %s5362_s24 = scalar_lea.vmem %s12_s23, 128  ;;  %p5367_p1 = scmp.lt.s32.totalorder %s12_s23, %s12_s23 }
   0x3   :  { %p5363_p0 = scmp.ne.s32.totalorder %s12_s23, %s5362_s24  ;;  %p5368_p2 = scmp.lt.s32.totalorder %s5362_s24, %s5362_s24 }
   0x5   :  { %p5369_p3 = por %p5368_p2, %p5367_p1 }
   0x7   :  { %p5370_p4 = pnand %p5369_p3, %p5363_p0 }
   0x9   :  { %5373 = shalt.err (!%p5370_p4)  }
   0xa   :  { %s5376_s25 = smov [#allocation4]  }
   0xb   :  { %14 = dma.vmem_to_smem %s12_s23, 128, %s5376_s25, [#allocation3] }
   0xc   :  { %5374 = dma.done.wait [#allocation3], 128 }
   0xd   :  { %5375 = vsyncadd [#allocation3], 4294967168 }
   0xe   :  { %16 = sfence }
   0xf   :  { %v5421_v0 = vld [vmem:[%s7072_s2 + $0x4] ss:$16 sps:$4 sm:$0xff]   ;;  %v5426_v1 = vld [vmem:[%s7072_s2] ss:$16 sps:$4 sm:$0xff]   ;;  %v5377_v2 = vmov 0   ;;  %v7077_v3 = vmov 0.0  }
  0x10   :  { %477 = vmatprep.mubr.bf16.mxu0 %v5377_v2  ;;  %28 = vst [vmem:[#allocation2] sm:$0xff] %v7077_v3  ;;  %518 = vmatprep.mubr.bf16.mxu1 %v5377_v2  ;;  %v5433_v4 = vld [vmem:[%s7072_s2 + $0x24] ss:$16 sps:$4 sm:$0xff]   ;;  %v5439_v5 = vld [vmem:[%s7072_s2 + $0x20] ss:$16 sps:$4 sm:$0xff]   ;;  %s29_s11 = sld [smem:[#allocation4]] }
  0x11   :  { %445 = vmatprep.subr.bf16.mxu0 %v5421_v0  ;;  %v5445_v6 = vld [vmem:[%s7072_s2 + $0x44] ss:$16 sps:$4 sm:$0xff]   ;;  %v5450_v7 = vld [vmem:[%s7072_s2 + $0xc] ss:$16 sps:$4 sm:$0xff]   ;;  %v5455_v8 = vld [vmem:[%s7072_s2 + $0x8] ss:$16 sps:$4 sm:$0xff]  }
  0x12   :  { %446 = vmatpush1.bf16.msra.mxu0 %v5426_v1  ;;  %v5461_v9 = vld [vmem:[%s7072_s2 + $0x40] ss:$16 sps:$4 sm:$0xff]   ;;  %486 = vmatprep.subr.bf16.mxu1 %v5450_v7  ;;  %v5468_v10 = vld [vmem:[%s7072_s2 + $0x64] ss:$16 sps:$4 sm:$0xff]   ;;  %v5474_v11 = vld [vmem:[%s7072_s2 + $0x2c] ss:$16 sps:$4 sm:$0xff]  }
  0x13   :  { %447 = vmatprep.subr.bf16.mxu0 %v5433_v4  ;;  %487 = vmatpush1.bf16.msra.mxu1 %v5455_v8  ;;  %v5479_v12 = vld [vmem:[%s7072_s2 + $0x28] ss:$16 sps:$4 sm:$0xff]   ;;  %v5486_v13 = vld [vmem:[%s7072_s2 + $0x60] ss:$16 sps:$4 sm:$0xff]   ;;  %v5491_v14 = vld [vmem:[%s7072_s2 + $0x84] ss:$16 sps:$4 sm:$0xff]  }
  0x14   :  { %488 = vmatprep.subr.bf16.mxu1 %v5474_v11  ;;  %v5496_v15 = vld [vmem:[%s7072_s2 + $0x4c] ss:$16 sps:$4 sm:$0xff]   ;;  %v5503_v16 = vld [vmem:[%s7072_s2 + $0x48] ss:$16 sps:$4 sm:$0xff]   ;;  %v5515_v18 = vld [vmem:[%s7072_s2 + $0x80] ss:$16 sps:$4 sm:$0xff]  }
  0x15   :  { %v5509_v17 = vld [vmem:[%s7072_s2 + $0x6c] ss:$16 sps:$4 sm:$0xff]   ;;  %v5521_v19 = vld [vmem:[%s7072_s2 + $0xa4] ss:$16 sps:$4 sm:$0xff]   ;;  %v5527_v20 = vld [vmem:[%s7072_s2 + $0x68] ss:$16 sps:$4 sm:$0xff]  }
  0x16   :  { %448 = vmatpush1.bf16.msra.mxu0 %v5439_v5  ;;  %v5533_v21 = vld [vmem:[%s7072_s2 + $0x8c] ss:$16 sps:$4 sm:$0xff]   ;;  %v5539_v22 = vld [vmem:[%s7072_s2 + $0xa0] ss:$16 sps:$4 sm:$0xff]   ;;  %v5544_v23 = vld [vmem:[%s7072_s2 + $0xc4] ss:$16 sps:$4 sm:$0xff]   ;;  %s30_s30 = scalar_lea.vmem %s7071_s1, %s29_s11 }
  0x17   :  { %449 = vmatprep.subr.bf16.mxu0 %v5445_v6  ;;  %489 = vmatpush1.bf16.msra.mxu1 %v5479_v12  ;;  %v5551_v24 = vld [vmem:[%s7072_s2 + $0x88] ss:$16 sps:$4 sm:$0xff]   ;;  %v5557_v25 = vld [vmem:[%s7072_s2 + $0xac] ss:$16 sps:$4 sm:$0xff]   ;;  %v5563_v26 = vld [vmem:[%s7072_s2 + $0xc0] ss:$16 sps:$4 sm:$0xff]  }
  0x18   :  { %490 = vmatprep.subr.bf16.mxu1 %v5496_v15  ;;  %v5569_v27 = vld [vmem:[%s7072_s2 + $0xe4] ss:$16 sps:$4 sm:$0xff]   ;;  %v5575_v28 = vld [vmem:[%s7072_s2 + $0xa8] ss:$16 sps:$4 sm:$0xff]   ;;  %v5581_v29 = vld [vmem:[%s7072_s2 + $0xcc] ss:$16 sps:$4 sm:$0xff]  }
  0x19   :  { %v5587_v30 = vld [vmem:[%s7072_s2 + $0xe0] ss:$16 sps:$4 sm:$0xff]   ;;  %v5592_v31 = vld [vmem:[%s7072_s2 + $0x104] ss:$16 sps:$4 sm:$0xff]   ;;  %v5599_v32 = vld [vmem:[%s7072_s2 + $0xc8] ss:$16 sps:$4 sm:$0xff]  }
  0x1a   :  { %450 = vmatpush1.bf16.msra.mxu0 %v5461_v9  ;;  %s4345_s14 = sld [smem:[#allocation4 + $0x1]]  ;;  %v5605_v33 = vld [vmem:[%s7072_s2 + $0xec] ss:$16 sps:$4 sm:$0xff]   ;;  %v5611_v34 = vld [vmem:[%s7072_s2 + $0x100] ss:$16 sps:$4 sm:$0xff]   ;;  %s4413_s13 = sld [smem:[#allocation4 + $0x80]] }
  0x1b   :  { %451 = vmatprep.subr.bf16.mxu0 %v5468_v10  ;;  %491 = vmatpush1.bf16.msra.mxu1 %v5503_v16  ;;  %v5617_v35 = vld [vmem:[%s7072_s2 + $0x124] ss:$16 sps:$4 sm:$0xff]   ;;  %v5623_v36 = vld [vmem:[%s7072_s2 + $0xe8] ss:$16 sps:$4 sm:$0xff]   ;;  %v5629_v37 = vld [vmem:[%s7072_s2 + $0x10c] ss:$16 sps:$4 sm:$0xff]  }
  0x1c   :  { %492 = vmatprep.subr.bf16.mxu1 %v5509_v17  ;;  %v5635_v38 = vld [vmem:[%s7072_s2 + $0x120] ss:$16 sps:$4 sm:$0xff]   ;;  %v5640_v39 = vld [vmem:[%s7072_s2 + $0x144] ss:$16 sps:$4 sm:$0xff]   ;;  %v5650_v40 = vld [vmem:[%s7072_s2 + $0x108] ss:$16 sps:$4 sm:$0xff]  }
  0x1d   :  { %v5659_v41 = vld [vmem:[%s7072_s2 + $0x12c] ss:$16 sps:$4 sm:$0xff]   ;;  %v5664_v42 = vld [vmem:[%s7072_s2 + $0x140] ss:$16 sps:$4 sm:$0xff]   ;;  %v5671_v45 = vld [vmem:[%s7072_s2 + $0x164] ss:$16 sps:$4 sm:$0xff]  }
  0x1e   :  { %452 = vmatpush1.bf16.msra.mxu0 %v5486_v13  ;;  %v31_v43 = vld [vmem:[%s30_s30] sm:$0x1]  ;;  %v5677_v46 = vld [vmem:[%s7072_s2 + $0x128] ss:$16 sps:$4 sm:$0xff]   ;;  %v5688_v48 = vld [vmem:[%s7072_s2 + $0x14c] ss:$16 sps:$4 sm:$0xff]  }
  0x1f   :  { %453 = vmatprep.subr.bf16.mxu0 %v5491_v14  ;;  %493 = vmatpush1.bf16.msra.mxu1 %v5527_v20  ;;  %32 = vst [vmem:[#allocation2] sm:$0x1] %v31_v43  ;;  %v5682_v47 = vld [vmem:[%s7072_s2 + $0x160] ss:$16 sps:$4 sm:$0xff]   ;;  %v5693_v49 = vld [vmem:[%s7072_s2 + $0x184] ss:$16 sps:$4 sm:$0xff]  }
  0x20   :  { %494 = vmatprep.subr.bf16.mxu1 %v5533_v21  ;;  %s34_s12 = scalar_lea.vmem %s7071_s1, %s4345_s14  ;;  %7178 = vst [vmem:[#allocation6_spill] sm:$0xff] %v5682_v47  ;;  %7179 = vst [vmem:[#allocation7_spill] sm:$0xff] %v5693_v49  ;;  %v5699_v50 = vld [vmem:[%s7072_s2 + $0x148] ss:$16 sps:$4 sm:$0xff]   ;;  %v5704_v51 = vld [vmem:[%s7072_s2 + $0x16c] ss:$16 sps:$4 sm:$0xff]   ;;  %s552_s14 = scalar_lea.vmem %s7071_s1, %s4413_s13 }
  0x21   :  { %v35_v44 = vld [vmem:[%s34_s12] sm:$0x1]  ;;  %7180 = vst [vmem:[#allocation8_spill] sm:$0xff] %v5704_v51  ;;  %v5717_v53 = vld [vmem:[%s7072_s2 + $0x1a4] ss:$16 sps:$4 sm:$0xff]   ;;  %s4414_s15 = sld [smem:[#allocation4 + $0x81]] }
  0x22   :  { %454 = vmatpush1.bf16.msra.mxu0 %v5515_v18  ;;  %36 = vst [vmem:[#allocation2 + $0x1] sm:$0x1] %v35_v44  ;;  %v5711_v52 = vld [vmem:[%s7072_s2 + $0x180] ss:$16 sps:$4 sm:$0xff]   ;;  %7182 = vst [vmem:[#allocation10_spill] sm:$0xff] %v5717_v53  ;;  %s4482_s22 = sld [smem:[#allocation4 + $0x100]] }
  0x23   :  { %455 = vmatprep.subr.bf16.mxu0 %v5521_v19  ;;  %495 = vmatpush1.bf16.msra.mxu1 %v5551_v24  ;;  %7181 = vst [vmem:[#allocation9_spill] sm:$0xff] %v5711_v52  ;;  %v5722_v54 = vld [vmem:[%s7072_s2 + $0x168] ss:$16 sps:$4 sm:$0xff]   ;;  %v5728_v55 = vld [vmem:[%s7072_s2 + $0x18c] ss:$16 sps:$4 sm:$0xff]   ;;  %s4483_s23 = sld [smem:[#allocation4 + $0x101]] }
  0x24   :  { %496 = vmatprep.subr.bf16.mxu1 %v5557_v25  ;;  %7183 = vst [vmem:[#allocation11_spill] sm:$0xff] %v5722_v54  ;;  %7184 = vst [vmem:[#allocation12_spill] sm:$0xff] %v5728_v55  ;;  %v5735_v56 = vld [vmem:[%s7072_s2 + $0x1a0] ss:$16 sps:$4 sm:$0xff]   ;;  %v5741_v57 = vld [vmem:[%s7072_s2 + $0x1c4] ss:$16 sps:$4 sm:$0xff]  }
  0x25   :  { %7185 = vst [vmem:[#allocation13_spill] sm:$0xff] %v5735_v56  ;;  %7186 = vst [vmem:[#allocation14_spill] sm:$0xff] %v5741_v57  ;;  %v5746_v58 = vld [vmem:[%s7072_s2 + $0x188] ss:$16 sps:$4 sm:$0xff]   ;;  %v5752_v59 = vld [vmem:[%s7072_s2 + $0x1ac] ss:$16 sps:$4 sm:$0xff]  }
  0x26   :  { %456 = vmatpush1.bf16.msra.mxu0 %v5539_v22  ;;  %7187 = vst [vmem:[#allocation15_spill] sm:$0xff] %v5746_v58  ;;  %7188 = vst [vmem:[#allocation16_spill] sm:$0xff] %v5752_v59  ;;  %v5759_v60 = vld [vmem:[%s7072_s2 + $0x1c0] ss:$16 sps:$4 sm:$0xff]   ;;  %v5765_v61 = vld [vmem:[%s7072_s2 + $0x1e4] ss:$16 sps:$4 sm:$0xff]  }
  0x27   :  { %457 = vmatprep.subr.bf16.mxu0 %v5544_v23  ;;  %497 = vmatpush1.bf16.msra.mxu1 %v5575_v28  ;;  %7189 = vst [vmem:[#allocation17_spill] sm:$0xff] %v5759_v60  ;;  %7190 = vst [vmem:[#allocation18_spill] sm:$0xff] %v5765_v61  ;;  %v5770_v62 = vld [vmem:[%s7072_s2 + $0x1a8] ss:$16 sps:$4 sm:$0xff]   ;;  %v5776_v63 = vld [vmem:[%s7072_s2 + $0x1cc] ss:$16 sps:$4 sm:$0xff]   ;;  %s556_s19 = scalar_lea.vmem %s7071_s1, %s4414_s15 }
  0x28   :  { %498 = vmatprep.subr.bf16.mxu1 %v5581_v29  ;;  %7191 = vst [vmem:[#allocation19_spill] sm:$0xff] %v5770_v62  ;;  %7192 = vst [vmem:[#allocation20_spill] sm:$0xff] %v5776_v63  ;;  %v5783_v2 = vld [vmem:[%s7072_s2 + $0x1e0] ss:$16 sps:$4 sm:$0xff]   ;;  %v5789_v44 = vld [vmem:[%s7072_s2 + $0x1c8] ss:$16 sps:$4 sm:$0xff]   ;;  %s1075_s26 = scalar_lea.vmem %s7071_s1, %s4482_s22 }
  0x29   :  { %7193 = vst [vmem:[#allocation21_spill] sm:$0xff] %v5783_v2  ;;  %v37_v43 = vld [vmem:[#allocation2] sm:$0xff]  ;;  %7194 = vst [vmem:[#allocation22_spill] sm:$0xff] %v5789_v44  ;;  %v5795_v3 = vld [vmem:[%s7072_s2 + $0x1ec] ss:$16 sps:$4 sm:$0xff]   ;;  %s1079_s0 = scalar_lea.vmem %s7071_s1, %s4483_s23  ;;  %s4551_s12 = sld [smem:[#allocation4 + $0x180]] }
  0x2a   :  { %458 = vmatpush1.bf16.msra.mxu0 %v5563_v26  ;;  %7195 = vst [vmem:[#allocation23_spill] sm:$0xff] %v5795_v3  ;;  %s4552_s13 = sld [smem:[#allocation4 + $0x181]]  ;;  %s4620_s20 = sld [smem:[#allocation4 + $0x200]]  ;;  %vm5379_vm0 = vmmov 0  }
  0x2b   :  { %459 = vmatprep.subr.bf16.mxu0 %v5569_v27  ;;  %499 = vmatpush1.bf16.msra.mxu1 %v5599_v32  ;;  %s4621_s21 = sld [smem:[#allocation4 + $0x201]]  ;;  %s4758_s15 = sld [smem:[#allocation4 + $0x300]] }
  0x2c   :  { %500 = vmatprep.subr.bf16.mxu1 %v5605_v33  ;;  %s4759_s11 = sld [smem:[#allocation4 + $0x301]]  ;;  %s4827_s18 = sld [smem:[#allocation4 + $0x380]] }
  0x2e   :  { %460 = vmatpush1.bf16.msra.mxu0 %v5587_v30 }
  0x2f   :  { %461 = vmatprep.subr.bf16.mxu0 %v5592_v31  ;;  %501 = vmatpush1.bf16.msra.mxu1 %v5623_v36  ;;  %s1598_s25 = scalar_lea.vmem %s7071_s1, %s4551_s12 }
  0x30   :  { %502 = vmatprep.subr.bf16.mxu1 %v5629_v37  ;;  %s1602_s28 = scalar_lea.vmem %s7071_s1, %s4552_s13  ;;  %s2121_s24 = scalar_lea.vmem %s7071_s1, %s4620_s20 }
  0x31   :  { %s2125_s27 = scalar_lea.vmem %s7071_s1, %s4621_s21 }
  0x32   :  { %462 = vmatpush1.bf16.msra.mxu0 %v5611_v34  ;;  %s3171_s22 = scalar_lea.vmem %s7071_s1, %s4759_s11 }
  0x33   :  { %463 = vmatprep.subr.bf16.mxu0 %v5617_v35  ;;  %503 = vmatpush1.bf16.msra.mxu1 %v5650_v40 }
  0x34   :  { %504 = vmatprep.subr.bf16.mxu1 %v5659_v41 }
  0x36   :  { %464 = vmatpush1.bf16.msra.mxu0 %v5635_v38 }
  0x37   :  { %465 = vmatprep.subr.bf16.mxu0 %v5640_v39  ;;  %505 = vmatpush1.bf16.msra.mxu1 %v5677_v46 }
  0x38   :  { %506 = vmatprep.subr.bf16.mxu1 %v5688_v48 }
  0x3a   :  { %466 = vmatpush1.bf16.msra.mxu0 %v5664_v42 }
  0x3b   :  { %467 = vmatprep.subr.bf16.mxu0 %v5671_v45  ;;  %507 = vmatpush1.bf16.msra.mxu1 %v5699_v50 }
  0x3c   :  { %508 = vmatprep.subr.bf16.mxu1 %v5704_v51 }
  0x3e   :  { %468 = vmatpush1.bf16.msra.mxu0 %v5682_v47 }
  0x3f   :  { %469 = vmatprep.subr.bf16.mxu0 %v5693_v49  ;;  %509 = vmatpush1.bf16.msra.mxu1 %v5722_v54 }
  0x40   :  { %510 = vmatprep.subr.bf16.mxu1 %v5728_v55 }
  0x42   :  { %470 = vmatpush1.bf16.msra.mxu0 %v5711_v52 }
  0x43   :  { %471 = vmatprep.subr.bf16.mxu0 %v5717_v53  ;;  %511 = vmatpush1.bf16.msra.mxu1 %v5746_v58  ;;  %v38_v58 = vpack.c.bf16 %v37_v43, %v37_v43  ;;  %v7198_v43 = vld [vmem:[#allocation16_spill] sm:$0xff] }
  0x44   :  { %512 = vmatprep.subr.bf16.mxu1 %v5752_v59  ;;  %v5803_v59 = vld [vmem:[%s7072_s2 + $0x1e8] ss:$16 sps:$4 sm:$0xff]  }
  0x45   :  { %7196 = vst [vmem:[#allocation24_spill] sm:$0xff] %v5803_v59 }
  0x46   :  { %472 = vmatpush1.bf16.msra.mxu0 %v5735_v56 }
  0x47   :  { %473 = vmatprep.subr.bf16.mxu0 %v5741_v57  ;;  %513 = vmatpush1.bf16.msra.mxu1 %v5770_v62 }
  0x48   :  { %514 = vmatprep.subr.bf16.mxu1 %v5776_v63 }
  0x4a   :  { %474 = vmatpush1.bf16.msra.mxu0 %v5759_v60 }
  0x4b   :  { %475 = vmatprep.subr.bf16.mxu0 %v5765_v61  ;;  %515 = vmatpush1.bf16.msra.mxu1 %v5789_v44 }
  0x4c   :  { %516 = vmatprep.subr.bf16.mxu1 %v5795_v3 }
  0x4e   :  { %476 = vmatpush1.bf16.msra.mxu0 %v5783_v2 }
  0x4f   :  { %968 = vmatprep.subr.bf16.mxu0 %v5421_v0  ;;  %517 = vmatpush1.bf16.msra.mxu1 %v5803_v59 }
  0x50   :  { %1009 = vmatprep.subr.bf16.mxu1 %v5450_v7 }
  0x51   :  { %478 = vmatmul.mubr.bf16.vlgmr.msra.gmra.mrb[0].mxu0 %v38_v58 }
  0x52   :  { %969 = vmatpush1.bf16.msra.mxu0 %v5426_v1  ;;  %519 = vmatmul.mubr.bf16.vlgmr.msra.gmra.mrb[0].mxu1 %v38_v58  ;;  %v7197_v58 = vld [vmem:[#allocation15_spill] sm:$0xff] }
  0x53   :  { %970 = vmatprep.subr.bf16.mxu0 %v5433_v4  ;;  %1010 = vmatpush1.bf16.msra.mxu1 %v5455_v8 }
  0x54   :  { %1011 = vmatprep.subr.bf16.mxu1 %v5474_v11 }
  0x56   :  { %971 = vmatpush1.bf16.msra.mxu0 %v5439_v5 }
  0x57   :  { %972 = vmatprep.subr.bf16.mxu0 %v5445_v6  ;;  %1012 = vmatpush1.bf16.msra.mxu1 %v5479_v12 }
  0x58   :  { %1013 = vmatprep.subr.bf16.mxu1 %v5496_v15 }
  0x5a   :  { %973 = vmatpush1.bf16.msra.mxu0 %v5461_v9 }
  0x5b   :  { %974 = vmatprep.subr.bf16.mxu0 %v5468_v10  ;;  %1014 = vmatpush1.bf16.msra.mxu1 %v5503_v16 }
  0x5c   :  { %1015 = vmatprep.subr.bf16.mxu1 %v5509_v17 }
  0x5e   :  { %975 = vmatpush1.bf16.msra.mxu0 %v5486_v13 }
  0x5f   :  { %976 = vmatprep.subr.bf16.mxu0 %v5491_v14  ;;  %1016 = vmatpush1.bf16.msra.mxu1 %v5527_v20 }
  0x60   :  { %1017 = vmatprep.subr.bf16.mxu1 %v5533_v21 }
  0x62   :  { %977 = vmatpush1.bf16.msra.mxu0 %v5515_v18 }
  0x63   :  { %978 = vmatprep.subr.bf16.mxu0 %v5521_v19  ;;  %1018 = vmatpush1.bf16.msra.mxu1 %v5551_v24 }
  0x64   :  { %1019 = vmatprep.subr.bf16.mxu1 %v5557_v25 }
  0x66   :  { %979 = vmatpush1.bf16.msra.mxu0 %v5539_v22 }
  0x67   :  { %980 = vmatprep.subr.bf16.mxu0 %v5544_v23  ;;  %1020 = vmatpush1.bf16.msra.mxu1 %v5575_v28 }
  0x68   :  { %1021 = vmatprep.subr.bf16.mxu1 %v5581_v29 }
  0x6a   :  { %981 = vmatpush1.bf16.msra.mxu0 %v5563_v26 }
  0x6b   :  { %982 = vmatprep.subr.bf16.mxu0 %v5569_v27  ;;  %1022 = vmatpush1.bf16.msra.mxu1 %v5599_v32 }
  0x6c   :  { %1023 = vmatprep.subr.bf16.mxu1 %v5605_v33 }
  0x6e   :  { %983 = vmatpush1.bf16.msra.mxu0 %v5587_v30 }
  0x6f   :  { %984 = vmatprep.subr.bf16.mxu0 %v5592_v31  ;;  %1024 = vmatpush1.bf16.msra.mxu1 %v5623_v36 }
  0x70   :  { %1025 = vmatprep.subr.bf16.mxu1 %v5629_v37 }
  0x72   :  { %985 = vmatpush1.bf16.msra.mxu0 %v5611_v34 }
  0x73   :  { %986 = vmatprep.subr.bf16.mxu0 %v5617_v35  ;;  %1026 = vmatpush1.bf16.msra.mxu1 %v5650_v40 }
  0x74   :  { %1027 = vmatprep.subr.bf16.mxu1 %v5659_v41 }
  0x76   :  { %987 = vmatpush1.bf16.msra.mxu0 %v5635_v38 }
  0x77   :  { %988 = vmatprep.subr.bf16.mxu0 %v5640_v39  ;;  %1028 = vmatpush1.bf16.msra.mxu1 %v5677_v46 }
  0x78   :  { %1029 = vmatprep.subr.bf16.mxu1 %v5688_v48 }
  0x7a   :  { %989 = vmatpush1.bf16.msra.mxu0 %v5664_v42 }
  0x7b   :  { %990 = vmatprep.subr.bf16.mxu0 %v5671_v45  ;;  %1030 = vmatpush1.bf16.msra.mxu1 %v5699_v50 }
  0x7c   :  { %1031 = vmatprep.subr.bf16.mxu1 %v5704_v51 }
  0x7e   :  { %991 = vmatpush1.bf16.msra.mxu0 %v5682_v47 }
  0x7f   :  { %992 = vmatprep.subr.bf16.mxu0 %v5693_v49  ;;  %1032 = vmatpush1.bf16.msra.mxu1 %v5722_v54 }
  0x80   :  { %1033 = vmatprep.subr.bf16.mxu1 %v5728_v55 }
  0x82   :  { %993 = vmatpush1.bf16.msra.mxu0 %v5711_v52 }
  0x83   :  { %994 = vmatprep.subr.bf16.mxu0 %v5717_v53  ;;  %1034 = vmatpush1.bf16.msra.mxu1 %v7197_v58 }
  0x84   :  { %1035 = vmatprep.subr.bf16.mxu1 %v7198_v43 }
  0x86   :  { %995 = vmatpush1.bf16.msra.mxu0 %v5735_v56 }
  0x87   :  { %996 = vmatprep.subr.bf16.mxu0 %v5741_v57  ;;  %1036 = vmatpush1.bf16.msra.mxu1 %v5770_v62 }
  0x88   :  { %1037 = vmatprep.subr.bf16.mxu1 %v5776_v63 }
  0x8a   :  { %997 = vmatpush1.bf16.msra.mxu0 %v5759_v60 }
  0x8b   :  { %998 = vmatprep.subr.bf16.mxu0 %v5765_v61  ;;  %1038 = vmatpush1.bf16.msra.mxu1 %v5789_v44  ;;  %v557_v61 = vld [vmem:[%s556_s19] sm:$0x1]  ;;  %s3167_s19 = scalar_lea.vmem %s7071_s1, %s4758_s15 }
  0x8c   :  { %1039 = vmatprep.subr.bf16.mxu1 %v5795_v3  ;;  %558 = vst [vmem:[#allocation2 + $0x1] sm:$0x1] %v557_v61 }
  0x8e   :  { %999 = vmatpush1.bf16.msra.mxu0 %v5783_v2  ;;  %v553_v2 = vld [vmem:[%s552_s14] sm:$0x1] }
  0x8f   :  { %1491 = vmatprep.subr.bf16.mxu0 %v5421_v0  ;;  %1040 = vmatpush1.bf16.msra.mxu1 %v5803_v59  ;;  %554 = vst [vmem:[#allocation2] sm:$0x1] %v553_v2  ;;  %v105_v0 = vlaneseq }
  0x90   :  { %1532 = vmatprep.subr.bf16.mxu1 %v5450_v7  ;;  %v103_v7 = vld [vmem:[%s7073_s3] sm:$0xf] }
  0x91   :  { %v106_v3 = vshrl.u32 %v105_v0, 7 }
  0x93   :  { %v5881_v44 = vsub.s32 0, %v106_v3  ;;  %v5886_v59 = vsub.s32 1, %v106_v3  ;;  %v5890_v57 = vsub.s32 3, %v106_v3  ;;  %v5893_v55 = vsub.s32 2, %v106_v3 }
  0x95   :  { %7199 = vst [vmem:[#allocation25_spill] sm:$0xff] %v5881_v44  ;;  %7200 = vst [vmem:[#allocation26_spill] sm:$0xff] %v5886_v59  ;;  %v108_v60 = vrot.slane %v103_v7, %v5881_v44  ;;  %v112_v63 = vrot.slane %v103_v7, %v5886_v59  ;;  %v120_v58 = vrot.slane %v103_v7, %v5890_v57 }
  0x96   :  { %v116_v47 = vrot.slane %v103_v7, %v5893_v55 }
 0x124   :  { %v479_v62 = vpop.f32.mrb[0].mxu0 }
 0x125   :  { %v480_v56 = vadd.f32 %v479_v62, %v108_v60  ;;  %v481_v2 = vpop.f32.mrb[1].mxu0  ;;  %v520_v49 = vpop.f32.mrb[0].mxu1 }
 0x126   :  { %v482_v61 = vadd.f32 %v481_v2, %v112_v63  ;;  %v483_v43 = vpop.f32.mrb[2].mxu0  ;;  %v522_v44 = vpop.f32.mrb[1].mxu1  ;;  %v521_v62 = vadd.f32 %v520_v49, %v116_v47  ;;  %v559_v49 = vld [vmem:[#allocation2] sm:$0xff] }
 0x127   :  { %v4410_v0 = vmul.f32 -1.442695, %v480_v56  ;;  %v484_v53 = vpop.f32.mrb[3].mxu0  ;;  %v523_v54 = vadd.f32 %v522_v44, %v120_v58  ;;  %v524_v59 = vpop.f32.mrb[2].mxu1  ;;  %v560_v7 = vpack.c.bf16 %v559_v49, %v559_v49 }
 0x128   :  { %v4411_v52 = vmul.f32 -1.442695, %v482_v61  ;;  %v525_v51 = vpop.f32.mrb[3].mxu1 }
 0x129   :  { %5234 = vpow2.f32 %v4410_v0  ;;  %v4412_v60 = vmul.f32 -1.442695, %v523_v54 }
 0x12a   :  { %5236 = vpow2.f32 %v4411_v52 }
 0x12b   :  { %5238 = vpow2.f32 %v4412_v60 }
 0x12c   :  { %5240 = vtanh.f32 %v521_v62 }
 0x133   :  { %v5235_v63 = vpop.eup %5234 }
 0x134   :  { %v5237_v56 = vpop.eup %5236  ;;  %v530_v53 = vadd.f32 1.0, %v5235_v63 }
 0x135   :  { %v536_v43 = vadd.f32 1.0, %v5237_v56  ;;  %v5239_v3 = vpop.eup %5238 }
 0x136   :  { %5242 = vrcp.f32 %v530_v53  ;;  %v5241_v2 = vpop.eup %5240  ;;  %v543_v52 = vadd.f32 1.0, %v5239_v3 }
 0x137   :  { %5244 = vrcp.f32 %v536_v43 }
 0x138   :  { %5246 = vrcp.f32 %v543_v52 }
 0x140   :  { %v5243_v61 = vpop.eup %5242 }
 0x141   :  { %v5245_v0 = vpop.eup %5244  ;;  %v547_v44 = vmul.f32 %v5243_v61, %v5241_v2 }
 0x142   :  { %v546_v59 = vmul.f32 0.0, %v5245_v0  ;;  %v5247_v47 = vpop.eup %5246 }
 0x144   :  { %v5896_v58 = vadd.f32 %v547_v44, %v546_v59 }
 0x146   :  { %5248 = vtanh.f32 %v5896_v58 }
 0x150   :  { %v5249_v51 = vpop.eup %5248 }
 0x151   :  { %v550_v54 = vmul.f32 %v5249_v51, %v5247_v47 }
 0x153   :  { %v561_v60 = vpack.c.bf16 %v550_v54, %v550_v54 }
 0x155   :  { %1000 = vmatprep.mubr.bf16.mxu0 %v561_v60  ;;  %1041 = vmatprep.mubr.bf16.mxu1 %v561_v60 }
 0x156   :  { %1001 = vmatmul.mubr.bf16.vlgmr.msra.gmra.mrb[4].mxu0 %v560_v7  ;;  %1042 = vmatmul.mubr.bf16.vlgmr.msra.gmra.mrb[4].mxu1 %v560_v7 }
 0x157   :  { %1492 = vmatpush1.bf16.msra.mxu0 %v5426_v1  ;;  %1533 = vmatpush1.bf16.msra.mxu1 %v5455_v8  ;;  %v7201_v1 = vld [vmem:[#allocation8_spill] sm:$0xff] }
 0x158   :  { %1493 = vmatprep.subr.bf16.mxu0 %v5433_v4  ;;  %1534 = vmatprep.subr.bf16.mxu1 %v5474_v11  ;;  %v7202_v4 = vld [vmem:[#allocation6_spill] sm:$0xff]  ;;  %v7205_v8 = vld [vmem:[#allocation12_spill] sm:$0xff] }
 0x159   :  { %v7208_v11 = vld [vmem:[#allocation10_spill] sm:$0xff] }
 0x15b   :  { %1494 = vmatpush1.bf16.msra.mxu0 %v5439_v5  ;;  %1535 = vmatpush1.bf16.msra.mxu1 %v5479_v12  ;;  %v7203_v5 = vld [vmem:[#allocation11_spill] sm:$0xff]  ;;  %v7209_v12 = vld [vmem:[#allocation16_spill] sm:$0xff] }
 0x15c   :  { %1495 = vmatprep.subr.bf16.mxu0 %v5445_v6  ;;  %1536 = vmatprep.subr.bf16.mxu1 %v5496_v15  ;;  %v7204_v6 = vld [vmem:[#allocation7_spill] sm:$0xff]  ;;  %v7212_v15 = vld [vmem:[#allocation14_spill] sm:$0xff] }
 0x15f   :  { %1496 = vmatpush1.bf16.msra.mxu0 %v5461_v9  ;;  %1537 = vmatpush1.bf16.msra.mxu1 %v5503_v16  ;;  %v7206_v9 = vld [vmem:[#allocation9_spill] sm:$0xff]  ;;  %v7213_v16 = vld [vmem:[#allocation20_spill] sm:$0xff] }
 0x160   :  { %1497 = vmatprep.subr.bf16.mxu0 %v5468_v10  ;;  %1538 = vmatprep.subr.bf16.mxu1 %v5509_v17  ;;  %v7207_v10 = vld [vmem:[#allocation15_spill] sm:$0xff]  ;;  %v7214_v17 = vld [vmem:[#allocation17_spill] sm:$0xff] }
 0x163   :  { %1498 = vmatpush1.bf16.msra.mxu0 %v5486_v13  ;;  %1539 = vmatpush1.bf16.msra.mxu1 %v5527_v20  ;;  %v7210_v13 = vld [vmem:[#allocation13_spill] sm:$0xff]  ;;  %v7217_v20 = vld [vmem:[#allocation23_spill] sm:$0xff] }
 0x164   :  { %1499 = vmatprep.subr.bf16.mxu0 %v5491_v14  ;;  %1540 = vmatprep.subr.bf16.mxu1 %v5533_v21  ;;  %v7211_v14 = vld [vmem:[#allocation19_spill] sm:$0xff]  ;;  %v7218_v21 = vld [vmem:[#allocation21_spill] sm:$0xff] }
 0x167   :  { %1500 = vmatpush1.bf16.msra.mxu0 %v5515_v18  ;;  %1541 = vmatpush1.bf16.msra.mxu1 %v5551_v24  ;;  %v7215_v18 = vld [vmem:[#allocation22_spill] sm:$0xff]  ;;  %v1080_v24 = vld [vmem:[%s1079_s0] sm:$0x1]  ;;  %s4690_s0 = sld [smem:[#allocation4 + $0x281]] }
 0x168   :  { %1501 = vmatprep.subr.bf16.mxu0 %v5521_v19  ;;  %1542 = vmatprep.subr.bf16.mxu1 %v5557_v25  ;;  %v7216_v19 = vld [vmem:[#allocation18_spill] sm:$0xff]  ;;  %1081 = vst [vmem:[#allocation2 + $0x1] sm:$0x1] %v1080_v24  ;;  %v5970_v25 = vld [vmem:[%s7072_s2 + $0x4] ss:$16 sps:$4 sm:$0xff]  }
 0x169   :  { %7220 = vst [vmem:[#allocation8_spill] sm:$0xff] %v5970_v25  ;;  %v6104_v24 = vld [vmem:[%s7072_s2 + $0x68] ss:$16 sps:$4 sm:$0xff]  }
 0x16b   :  { %1502 = vmatpush1.bf16.msra.mxu0 %v5539_v22  ;;  %1543 = vmatpush1.bf16.msra.mxu1 %v5575_v28  ;;  %v7219_v22 = vld [vmem:[#allocation24_spill] sm:$0xff]  ;;  %v7222_v28 = vld [vmem:[#allocation25_spill] sm:$0xff] }
 0x16c   :  { %1503 = vmatprep.subr.bf16.mxu0 %v5544_v23  ;;  %1544 = vmatprep.subr.bf16.mxu1 %v5581_v29  ;;  %v1076_v23 = vld [vmem:[%s1075_s26] sm:$0x1] }
 0x16d   :  { %1077 = vst [vmem:[#allocation2] sm:$0x1] %v1076_v23  ;;  %v6099_v23 = vld [vmem:[%s7072_s2 + $0xc0] ss:$16 sps:$4 sm:$0xff]   ;;  %s2648_s10 = scalar_lea.vmem %s7071_s1, %s4690_s0 }
 0x16f   :  { %1504 = vmatpush1.bf16.msra.mxu0 %v5563_v26  ;;  %1545 = vmatpush1.bf16.msra.mxu1 %v5599_v32  ;;  %v5976_v26 = vld [vmem:[%s7072_s2 + $0xc] ss:$16 sps:$4 sm:$0xff]  }
 0x170   :  { %1505 = vmatprep.subr.bf16.mxu0 %v5569_v27  ;;  %1546 = vmatprep.subr.bf16.mxu1 %v5605_v33  ;;  %7221 = vst [vmem:[#allocation6_spill] sm:$0xff] %v5976_v26  ;;  %v626_v27 = vld [vmem:[%s7073_s3] sm:$0xf] }
 0x171   :  { %v631_v29 = vrot.slane %v626_v27, %v7222_v28 }
 0x173   :  { %1506 = vmatpush1.bf16.msra.mxu0 %v5587_v30  ;;  %1547 = vmatpush1.bf16.msra.mxu1 %v5623_v36  ;;  %v7223_v30 = vld [vmem:[#allocation26_spill] sm:$0xff] }
 0x174   :  { %1507 = vmatprep.subr.bf16.mxu0 %v5592_v31  ;;  %1548 = vmatprep.subr.bf16.mxu1 %v5629_v37  ;;  %v635_v31 = vrot.slane %v626_v27, %v7223_v30  ;;  %v1082_v54 = vld [vmem:[#allocation2] sm:$0xff] }
 0x177   :  { %1508 = vmatpush1.bf16.msra.mxu0 %v5611_v34  ;;  %1549 = vmatpush1.bf16.msra.mxu1 %v5650_v40 }
 0x178   :  { %1509 = vmatprep.subr.bf16.mxu0 %v5617_v35  ;;  %1550 = vmatprep.subr.bf16.mxu1 %v5659_v41 }
 0x17b   :  { %1510 = vmatpush1.bf16.msra.mxu0 %v5635_v38  ;;  %1551 = vmatpush1.bf16.msra.mxu1 %v5677_v46 }
 0x17c   :  { %1511 = vmatprep.subr.bf16.mxu0 %v5640_v39  ;;  %1552 = vmatprep.subr.bf16.mxu1 %v5688_v48 }
 0x17f   :  { %1512 = vmatpush1.bf16.msra.mxu0 %v5664_v42  ;;  %1553 = vmatpush1.bf16.msra.mxu1 %v5699_v50  ;;  %v643_v42 = vrot.slane %v626_v27, %v5890_v57  ;;  %v639_v50 = vrot.slane %v626_v27, %v5893_v55  ;;  %v6113_v27 = vld [vmem:[%s7072_s2 + $0xe4] ss:$16 sps:$4 sm:$0xff]  }
 0x180   :  { %1513 = vmatprep.subr.bf16.mxu0 %v5671_v45  ;;  %1554 = vmatprep.subr.bf16.mxu1 %v7201_v1  ;;  %v1083_v1 = vpack.c.bf16 %v1082_v54, %v1082_v54  ;;  %v6302_v54 = vld [vmem:[%s7072_s2 + $0x1e4] ss:$16 sps:$4 sm:$0xff]  }
 0x181   :  { %7237 = vst [vmem:[#allocation18_spill] sm:$0xff] %v6302_v54 }
 0x183   :  { %1514 = vmatpush1.bf16.msra.mxu0 %v7202_v4  ;;  %1555 = vmatpush1.bf16.msra.mxu1 %v7203_v5  ;;  %v5993_v5 = vld [vmem:[%s7072_s2] ss:$16 sps:$4 sm:$0xff]  }
 0x184   :  { %1515 = vmatprep.subr.bf16.mxu0 %v7204_v6  ;;  %1556 = vmatprep.subr.bf16.mxu1 %v7205_v8  ;;  %v6003_v6 = vld [vmem:[%s7072_s2 + $0x24] ss:$16 sps:$4 sm:$0xff]   ;;  %v6009_v8 = vld [vmem:[%s7072_s2 + $0x20] ss:$16 sps:$4 sm:$0xff]  }
 0x187   :  { %1516 = vmatpush1.bf16.msra.mxu0 %v7206_v9  ;;  %1557 = vmatpush1.bf16.msra.mxu1 %v7207_v10  ;;  %v6016_v9 = vld [vmem:[%s7072_s2 + $0x44] ss:$16 sps:$4 sm:$0xff]   ;;  %v6022_v10 = vld [vmem:[%s7072_s2 + $0x40] ss:$16 sps:$4 sm:$0xff]  }
 0x188   :  { %1517 = vmatprep.subr.bf16.mxu0 %v7208_v11  ;;  %1558 = vmatprep.subr.bf16.mxu1 %v7209_v12  ;;  %v6028_v11 = vld [vmem:[%s7072_s2 + $0x64] ss:$16 sps:$4 sm:$0xff]   ;;  %v6034_v12 = vld [vmem:[%s7072_s2 + $0x60] ss:$16 sps:$4 sm:$0xff]  }
 0x18b   :  { %1518 = vmatpush1.bf16.msra.mxu0 %v7210_v13  ;;  %1559 = vmatpush1.bf16.msra.mxu1 %v7211_v14  ;;  %v6041_v13 = vld [vmem:[%s7072_s2 + $0x84] ss:$16 sps:$4 sm:$0xff]   ;;  %v6046_v14 = vld [vmem:[%s7072_s2 + $0x2c] ss:$16 sps:$4 sm:$0xff]  }
 0x18c   :  { %1519 = vmatprep.subr.bf16.mxu0 %v7212_v15  ;;  %1560 = vmatprep.subr.bf16.mxu1 %v7213_v16  ;;  %v6051_v15 = vld [vmem:[%s7072_s2 + $0x80] ss:$16 sps:$4 sm:$0xff]   ;;  %v6056_v16 = vld [vmem:[%s7072_s2 + $0x28] ss:$16 sps:$4 sm:$0xff]  }
 0x18f   :  { %1520 = vmatpush1.bf16.msra.mxu0 %v7214_v17  ;;  %1561 = vmatpush1.bf16.msra.mxu1 %v7215_v18  ;;  %v6065_v17 = vld [vmem:[%s7072_s2 + $0xa4] ss:$16 sps:$4 sm:$0xff]   ;;  %v6070_v18 = vld [vmem:[%s7072_s2 + $0x4c] ss:$16 sps:$4 sm:$0xff]  }
 0x190   :  { %1521 = vmatprep.subr.bf16.mxu0 %v7216_v19  ;;  %1562 = vmatprep.subr.bf16.mxu1 %v7217_v20  ;;  %v6075_v19 = vld [vmem:[%s7072_s2 + $0xa0] ss:$16 sps:$4 sm:$0xff]   ;;  %v6080_v20 = vld [vmem:[%s7072_s2 + $0x48] ss:$16 sps:$4 sm:$0xff]  }
 0x193   :  { %1522 = vmatpush1.bf16.msra.mxu0 %v7218_v21  ;;  %1563 = vmatpush1.bf16.msra.mxu1 %v7219_v22  ;;  %v6089_v21 = vld [vmem:[%s7072_s2 + $0xc4] ss:$16 sps:$4 sm:$0xff]   ;;  %v6094_v22 = vld [vmem:[%s7072_s2 + $0x6c] ss:$16 sps:$4 sm:$0xff]  }
 0x194   :  { %2014 = vmatprep.subr.bf16.mxu0 %v5970_v25  ;;  %2055 = vmatprep.subr.bf16.mxu1 %v5976_v26 }
 0x229   :  { %v1002_v32 = vpop.f32.mrb[4].mxu0  ;;  %v1043_v33 = vpop.f32.mrb[4].mxu1 }
 0x22a   :  { %v1003_v34 = vadd.f32 %v1002_v32, %v631_v29  ;;  %v1004_v35 = vpop.f32.mrb[5].mxu0  ;;  %v1045_v36 = vpop.f32.mrb[5].mxu1  ;;  %v1044_v63 = vadd.f32 %v1043_v33, %v639_v50  ;;  %v6118_v29 = vld [vmem:[%s7072_s2 + $0x8c] ss:$16 sps:$4 sm:$0xff]   ;;  %v6128_v32 = vld [vmem:[%s7072_s2 + $0x88] ss:$16 sps:$4 sm:$0xff]  }
 0x22b   :  { %v1005_v37 = vadd.f32 %v1004_v35, %v635_v31  ;;  %v1006_v38 = vpop.f32.mrb[6].mxu0  ;;  %v1047_v39 = vpop.f32.mrb[6].mxu1  ;;  %v1046_v48 = vadd.f32 %v1045_v36, %v643_v42  ;;  %v6123_v31 = vld [vmem:[%s7072_s2 + $0xe0] ss:$16 sps:$4 sm:$0xff]   ;;  %v6137_v33 = vld [vmem:[%s7072_s2 + $0x104] ss:$16 sps:$4 sm:$0xff]  }
 0x22c   :  { %v4479_v40 = vmul.f32 -1.442695, %v1003_v34  ;;  %v1007_v41 = vpop.f32.mrb[7].mxu0  ;;  %v1048_v45 = vpop.f32.mrb[7].mxu1  ;;  %v6142_v34 = vld [vmem:[%s7072_s2 + $0xac] ss:$16 sps:$4 sm:$0xff]  }
 0x22d   :  { %v4480_v46 = vmul.f32 -1.442695, %v1005_v37  ;;  %v4481_v62 = vmul.f32 -1.442695, %v1046_v48  ;;  %v6147_v35 = vld [vmem:[%s7072_s2 + $0x100] ss:$16 sps:$4 sm:$0xff]  }
 0x22e   :  { %5250 = vpow2.f32 %v4479_v40  ;;  %v6152_v36 = vld [vmem:[%s7072_s2 + $0xa8] ss:$16 sps:$4 sm:$0xff]   ;;  %v6161_v37 = vld [vmem:[%s7072_s2 + $0x124] ss:$16 sps:$4 sm:$0xff]   ;;  %v6166_v38 = vld [vmem:[%s7072_s2 + $0xcc] ss:$16 sps:$4 sm:$0xff]  }
 0x22f   :  { %5252 = vpow2.f32 %v4480_v46  ;;  %v6171_v39 = vld [vmem:[%s7072_s2 + $0x120] ss:$16 sps:$4 sm:$0xff]   ;;  %v6176_v40 = vld [vmem:[%s7072_s2 + $0xc8] ss:$16 sps:$4 sm:$0xff]   ;;  %v6185_v41 = vld [vmem:[%s7072_s2 + $0x144] ss:$16 sps:$4 sm:$0xff]  }
 0x230   :  { %5254 = vpow2.f32 %v4481_v62  ;;  %v6190_v42 = vld [vmem:[%s7072_s2 + $0xec] ss:$16 sps:$4 sm:$0xff]   ;;  %v6195_v45 = vld [vmem:[%s7072_s2 + $0x140] ss:$16 sps:$4 sm:$0xff]   ;;  %v6200_v46 = vld [vmem:[%s7072_s2 + $0xe8] ss:$16 sps:$4 sm:$0xff]  }
 0x231   :  { %5256 = vtanh.f32 %v1044_v63  ;;  %7224 = vst [vmem:[#allocation11_spill] sm:$0xff] %v6195_v45  ;;  %v6209_v48 = vld [vmem:[%s7072_s2 + $0x164] ss:$16 sps:$4 sm:$0xff]   ;;  %v6214_v50 = vld [vmem:[%s7072_s2 + $0x10c] ss:$16 sps:$4 sm:$0xff]  }
 0x232   :  { %7225 = vst [vmem:[#allocation7_spill] sm:$0xff] %v6209_v48  ;;  %v6219_v62 = vld [vmem:[%s7072_s2 + $0x160] ss:$16 sps:$4 sm:$0xff]   ;;  %v6224_v63 = vld [vmem:[%s7072_s2 + $0x108] ss:$16 sps:$4 sm:$0xff]  }
 0x233   :  { %7226 = vst [vmem:[#allocation12_spill] sm:$0xff] %v6219_v62 }
 0x238   :  { %v5251_v56 = vpop.eup %5250 }
 0x239   :  { %v5253_v53 = vpop.eup %5252  ;;  %v1053_v43 = vadd.f32 1.0, %v5251_v56  ;;  %v6233_v56 = vld [vmem:[%s7072_s2 + $0x180] ss:$16 sps:$4 sm:$0xff]  }
 0x23a   :  { %v1059_v3 = vadd.f32 1.0, %v5253_v53  ;;  %v5255_v2 = vpop.eup %5254  ;;  %7227 = vst [vmem:[#allocation9_spill] sm:$0xff] %v6233_v56  ;;  %v6238_v53 = vld [vmem:[%s7072_s2 + $0x184] ss:$16 sps:$4 sm:$0xff]  }
 0x23b   :  { %5258 = vrcp.f32 %v1053_v43  ;;  %v5257_v61 = vpop.eup %5256  ;;  %v1066_v0 = vadd.f32 1.0, %v5255_v2  ;;  %7228 = vst [vmem:[#allocation15_spill] sm:$0xff] %v6238_v53  ;;  %v6243_v43 = vld [vmem:[%s7072_s2 + $0x128] ss:$16 sps:$4 sm:$0xff]   ;;  %v6253_v2 = vld [vmem:[%s7072_s2 + $0x1a4] ss:$16 sps:$4 sm:$0xff]  }
 0x23c   :  { %5260 = vrcp.f32 %v1059_v3  ;;  %v6248_v3 = vld [vmem:[%s7072_s2 + $0x12c] ss:$16 sps:$4 sm:$0xff]   ;;  %7229 = vst [vmem:[#allocation10_spill] sm:$0xff] %v6253_v2 }
 0x23d   :  { %5262 = vrcp.f32 %v1066_v0  ;;  %v6273_v0 = vld [vmem:[%s7072_s2 + $0x148] ss:$16 sps:$4 sm:$0xff]  }
 0x23e   :  { %7232 = vst [vmem:[#allocation19_spill] sm:$0xff] %v6273_v0 }
 0x245   :  { %v5259_v52 = vpop.eup %5258 }
 0x246   :  { %v5261_v44 = vpop.eup %5260  ;;  %v1070_v59 = vmul.f32 %v5259_v52, %v5257_v61  ;;  %v6259_v61 = vld [vmem:[%s7072_s2 + $0x14c] ss:$16 sps:$4 sm:$0xff]   ;;  %v6266_v52 = vld [vmem:[%s7072_s2 + $0x1a0] ss:$16 sps:$4 sm:$0xff]  }
 0x247   :  { %v1069_v47 = vmul.f32 %v5261_v44, %v5896_v58  ;;  %v5263_v51 = vpop.eup %5262  ;;  %v5998_v58 = vld [vmem:[%s7072_s2 + $0x8] ss:$16 sps:$4 sm:$0xff]   ;;  %7230 = vst [vmem:[#allocation16_spill] sm:$0xff] %v6259_v61  ;;  %7231 = vst [vmem:[#allocation13_spill] sm:$0xff] %v6266_v52  ;;  %v6278_v44 = vld [vmem:[%s7072_s2 + $0x1c4] ss:$16 sps:$4 sm:$0xff]  }
 0x248   :  { %7233 = vst [vmem:[#allocation14_spill] sm:$0xff] %v6278_v44 }
 0x249   :  { %v5987_v49 = vadd.f32 %v1070_v59, %v1069_v47  ;;  %v6284_v59 = vld [vmem:[%s7072_s2 + $0x16c] ss:$16 sps:$4 sm:$0xff]   ;;  %v6290_v47 = vld [vmem:[%s7072_s2 + $0x1c0] ss:$16 sps:$4 sm:$0xff]  }
 0x24a   :  { %7234 = vst [vmem:[#allocation20_spill] sm:$0xff] %v6284_v59  ;;  %7235 = vst [vmem:[#allocation17_spill] sm:$0xff] %v6290_v47 }
 0x24b   :  { %5264 = vtanh.f32 %v5987_v49 }
 0x255   :  { %v5265_v7 = vpop.eup %5264 }
 0x256   :  { %v1073_v60 = vmul.f32 %v5265_v7, %v5263_v51  ;;  %v6297_v51 = vld [vmem:[%s7072_s2 + $0x168] ss:$16 sps:$4 sm:$0xff]   ;;  %v6308_v7 = vld [vmem:[%s7072_s2 + $0x18c] ss:$16 sps:$4 sm:$0xff]  }
 0x257   :  { %7236 = vst [vmem:[#allocation22_spill] sm:$0xff] %v6297_v51  ;;  %7238 = vst [vmem:[#allocation23_spill] sm:$0xff] %v6308_v7 }
 0x258   :  { %v1084_v4 = vpack.c.bf16 %v1073_v60, %v1073_v60  ;;  %v6314_v60 = vld [vmem:[%s7072_s2 + $0x1e0] ss:$16 sps:$4 sm:$0xff]  }
 0x259   :  { %7239 = vst [vmem:[#allocation21_spill] sm:$0xff] %v6314_v60 }
 0x25a   :  { %1523 = vmatprep.mubr.bf16.mxu0 %v1084_v4  ;;  %1564 = vmatprep.mubr.bf16.mxu1 %v1084_v4  ;;  %v1599_v4 = vld [vmem:[%s1598_s25] sm:$0x1] }
 0x25b   :  { %1524 = vmatmul.mubr.bf16.vlgmr.msra.gmra.mrb[8].mxu0 %v1083_v1  ;;  %1565 = vmatmul.mubr.bf16.vlgmr.msra.gmra.mrb[8].mxu1 %v1083_v1  ;;  %v6327_v1 = vld [vmem:[%s7072_s2 + $0x188] ss:$16 sps:$4 sm:$0xff]   ;;  %1600 = vst [vmem:[#allocation2] sm:$0x1] %v1599_v4 }
 0x25c   :  { %2015 = vmatpush1.bf16.msra.mxu0 %v5993_v5  ;;  %2056 = vmatpush1.bf16.msra.mxu1 %v5998_v58  ;;  %7240 = vst [vmem:[#allocation24_spill] sm:$0xff] %v6327_v1  ;;  %v6353_v4 = vld [vmem:[%s7072_s2 + $0x1c8] ss:$16 sps:$4 sm:$0xff]  }
 0x25d   :  { %2016 = vmatprep.subr.bf16.mxu0 %v6003_v6  ;;  %2057 = vmatprep.subr.bf16.mxu1 %v6046_v14  ;;  %7244 = vst [vmem:[#allocation30_spill] sm:$0xff] %v6353_v4 }
 0x260   :  { %2017 = vmatpush1.bf16.msra.mxu0 %v6009_v8  ;;  %2058 = vmatpush1.bf16.msra.mxu1 %v6056_v16 }
 0x261   :  { %2018 = vmatprep.subr.bf16.mxu0 %v6016_v9  ;;  %2059 = vmatprep.subr.bf16.mxu1 %v6070_v18 }
 0x264   :  { %2019 = vmatpush1.bf16.msra.mxu0 %v6022_v10  ;;  %2060 = vmatpush1.bf16.msra.mxu1 %v6080_v20 }
 0x265   :  { %2020 = vmatprep.subr.bf16.mxu0 %v6028_v11  ;;  %2061 = vmatprep.subr.bf16.mxu1 %v6094_v22 }
 0x268   :  { %2021 = vmatpush1.bf16.msra.mxu0 %v6034_v12  ;;  %2062 = vmatpush1.bf16.msra.mxu1 %v6104_v24 }
 0x269   :  { %2022 = vmatprep.subr.bf16.mxu0 %v6041_v13  ;;  %2063 = vmatprep.subr.bf16.mxu1 %v6118_v29 }
 0x26c   :  { %2023 = vmatpush1.bf16.msra.mxu0 %v6051_v15  ;;  %2064 = vmatpush1.bf16.msra.mxu1 %v6128_v32 }
 0x26d   :  { %2024 = vmatprep.subr.bf16.mxu0 %v6065_v17  ;;  %2065 = vmatprep.subr.bf16.mxu1 %v6142_v34 }
 0x270   :  { %2025 = vmatpush1.bf16.msra.mxu0 %v6075_v19  ;;  %2066 = vmatpush1.bf16.msra.mxu1 %v6152_v36 }
 0x271   :  { %2026 = vmatprep.subr.bf16.mxu0 %v6089_v21  ;;  %2067 = vmatprep.subr.bf16.mxu1 %v6166_v38 }
 0x274   :  { %2027 = vmatpush1.bf16.msra.mxu0 %v6099_v23  ;;  %2068 = vmatpush1.bf16.msra.mxu1 %v6176_v40 }
 0x275   :  { %2028 = vmatprep.subr.bf16.mxu0 %v6113_v27  ;;  %2069 = vmatprep.subr.bf16.mxu1 %v6190_v42 }
 0x278   :  { %2029 = vmatpush1.bf16.msra.mxu0 %v6123_v31  ;;  %2070 = vmatpush1.bf16.msra.mxu1 %v6200_v46 }
 0x279   :  { %2030 = vmatprep.subr.bf16.mxu0 %v6137_v33  ;;  %2071 = vmatprep.subr.bf16.mxu1 %v6214_v50 }
 0x27c   :  { %2031 = vmatpush1.bf16.msra.mxu0 %v6147_v35  ;;  %2072 = vmatpush1.bf16.msra.mxu1 %v6224_v63 }
 0x27d   :  { %2032 = vmatprep.subr.bf16.mxu0 %v6161_v37  ;;  %2073 = vmatprep.subr.bf16.mxu1 %v6248_v3 }
 0x280   :  { %2033 = vmatpush1.bf16.msra.mxu0 %v6171_v39  ;;  %2074 = vmatpush1.bf16.msra.mxu1 %v6243_v43 }
 0x281   :  { %2034 = vmatprep.subr.bf16.mxu0 %v6185_v41  ;;  %2075 = vmatprep.subr.bf16.mxu1 %v6259_v61 }
 0x284   :  { %2035 = vmatpush1.bf16.msra.mxu0 %v6195_v45  ;;  %2076 = vmatpush1.bf16.msra.mxu1 %v6273_v0 }
 0x285   :  { %2036 = vmatprep.subr.bf16.mxu0 %v6209_v48  ;;  %2077 = vmatprep.subr.bf16.mxu1 %v6284_v59 }
 0x288   :  { %2037 = vmatpush1.bf16.msra.mxu0 %v6219_v62  ;;  %2078 = vmatpush1.bf16.msra.mxu1 %v6297_v51 }
 0x289   :  { %2038 = vmatprep.subr.bf16.mxu0 %v6238_v53  ;;  %2079 = vmatprep.subr.bf16.mxu1 %v6308_v7 }
 0x28c   :  { %2039 = vmatpush1.bf16.msra.mxu0 %v6233_v56  ;;  %2080 = vmatpush1.bf16.msra.mxu1 %v6327_v1 }
 0x28d   :  { %2040 = vmatprep.subr.bf16.mxu0 %v6253_v2 }
 0x290   :  { %2041 = vmatpush1.bf16.msra.mxu0 %v6266_v52 }
 0x291   :  { %2042 = vmatprep.subr.bf16.mxu0 %v6278_v44  ;;  %v6335_v44 = vld [vmem:[%s7072_s2 + $0x1ac] ss:$16 sps:$4 sm:$0xff]  }
 0x292   :  { %7241 = vst [vmem:[#allocation27_spill] sm:$0xff] %v6335_v44  ;;  %2081 = vmatprep.subr.bf16.mxu1 %v6335_v44 }
 0x294   :  { %2043 = vmatpush1.bf16.msra.mxu0 %v6290_v47  ;;  %v1603_v47 = vld [vmem:[%s1602_s28] sm:$0x1]  ;;  %s4689_s28 = sld [smem:[#allocation4 + $0x280]] }
 0x295   :  { %2044 = vmatprep.subr.bf16.mxu0 %v6302_v54  ;;  %1604 = vst [vmem:[#allocation2 + $0x1] sm:$0x1] %v1603_v47  ;;  %v6341_v54 = vld [vmem:[%s7072_s2 + $0x1a8] ss:$16 sps:$4 sm:$0xff]   ;;  %v6347_v47 = vld [vmem:[%s7072_s2 + $0x1cc] ss:$16 sps:$4 sm:$0xff]  }
 0x296   :  { %7242 = vst [vmem:[#allocation28_spill] sm:$0xff] %v6341_v54  ;;  %7243 = vst [vmem:[#allocation29_spill] sm:$0xff] %v6347_v47  ;;  %2082 = vmatpush1.bf16.msra.mxu1 %v6341_v54 }
 0x297   :  { %2083 = vmatprep.subr.bf16.mxu1 %v6347_v47  ;;  %v1149_v47 = vld [vmem:[%s7073_s3] sm:$0xf] }
 0x298   :  { %2045 = vmatpush1.bf16.msra.mxu0 %v6314_v60  ;;  %v6365_v60 = vld [vmem:[%s7072_s2 + $0x1e8] ss:$16 sps:$4 sm:$0xff]   ;;  %v1154_v54 = vrot.slane %v1149_v47, %v7222_v28  ;;  %v1158_v52 = vrot.slane %v1149_v47, %v7223_v30  ;;  %v1162_v28 = vrot.slane %v1149_v47, %v5893_v55 }
 0x299   :  { %2537 = vmatprep.subr.bf16.mxu0 %v5970_v25  ;;  %v6359_v25 = vld [vmem:[%s7072_s2 + $0x1ec] ss:$16 sps:$4 sm:$0xff]   ;;  %7246 = vst [vmem:[#allocation32_spill] sm:$0xff] %v6365_v60 }
 0x29a   :  { %7245 = vst [vmem:[#allocation31_spill] sm:$0xff] %v6359_v25  ;;  %2084 = vmatpush1.bf16.msra.mxu1 %v6353_v4  ;;  %s2644_s7 = scalar_lea.vmem %s7071_s1, %s4689_s28  ;;  %s3690_s28 = scalar_lea.vmem %s7071_s1, %s4827_s18 }
 0x29b   :  { %2085 = vmatprep.subr.bf16.mxu1 %v6359_v25 }
 0x29e   :  { %2086 = vmatpush1.bf16.msra.mxu1 %v6365_v60 }
 0x29f   :  { %2578 = vmatprep.subr.bf16.mxu1 %v5976_v26  ;;  %v1166_v26 = vrot.slane %v1149_v47, %v5890_v57  ;;  %v7251_v47 = vld [vmem:[#allocation12_spill] sm:$0xff] }
 0x32e   :  { %v1525_v4 = vpop.f32.mrb[8].mxu0  ;;  %v1566_v44 = vpop.f32.mrb[8].mxu1 }
 0x32f   :  { %v1526_v2 = vadd.f32 %v1525_v4, %v1154_v54  ;;  %v1527_v1 = vpop.f32.mrb[9].mxu0  ;;  %v1568_v56 = vpop.f32.mrb[9].mxu1  ;;  %v1567_v0 = vadd.f32 %v1566_v44, %v1162_v28 }
 0x330   :  { %v1528_v7 = vadd.f32 %v1527_v1, %v1158_v52  ;;  %v1529_v53 = vpop.f32.mrb[10].mxu0  ;;  %v1570_v25 = vpop.f32.mrb[10].mxu1  ;;  %v1569_v48 = vadd.f32 %v1568_v56, %v1166_v26  ;;  %v7250_v1 = vld [vmem:[#allocation20_spill] sm:$0xff] }
 0x331   :  { %v4548_v51 = vmul.f32 -1.442695, %v1526_v2  ;;  %v1530_v60 = vpop.f32.mrb[11].mxu0  ;;  %v1571_v62 = vpop.f32.mrb[11].mxu1 }
 0x332   :  { %v4549_v59 = vmul.f32 -1.442695, %v1528_v7  ;;  %v4550_v30 = vmul.f32 -1.442695, %v1569_v48  ;;  %v7249_v60 = vld [vmem:[#allocation7_spill] sm:$0xff] }
 0x333   :  { %5266 = vpow2.f32 %v4548_v51 }
 0x334   :  { %5268 = vpow2.f32 %v4549_v59  ;;  %v7248_v59 = vld [vmem:[#allocation19_spill] sm:$0xff] }
 0x335   :  { %5270 = vpow2.f32 %v4550_v30  ;;  %v1605_v30 = vld [vmem:[#allocation2] sm:$0xff] }
 0x336   :  { %5272 = vtanh.f32 %v1567_v0  ;;  %v1606_v0 = vpack.c.bf16 %v1605_v30, %v1605_v30  ;;  %v7263_v30 = vld [vmem:[#allocation17_spill] sm:$0xff] }
 0x33d   :  { %v5267_v45 = vpop.eup %5266 }
 0x33e   :  { %v5269_v54 = vpop.eup %5268  ;;  %v1576_v4 = vadd.f32 1.0, %v5267_v45 }
 0x33f   :  { %v1582_v53 = vadd.f32 1.0, %v5269_v54  ;;  %v5271_v25 = vpop.eup %5270  ;;  %v7252_v54 = vld [vmem:[#allocation22_spill] sm:$0xff] }
 0x340   :  { %5274 = vrcp.f32 %v1576_v4  ;;  %v5273_v2 = vpop.eup %5272  ;;  %v1589_v62 = vadd.f32 1.0, %v5271_v25  ;;  %v7253_v4 = vld [vmem:[#allocation15_spill] sm:$0xff]  ;;  %v7255_v25 = vld [vmem:[#allocation9_spill] sm:$0xff] }
 0x341   :  { %5276 = vrcp.f32 %v1582_v53  ;;  %v7254_v53 = vld [vmem:[#allocation23_spill] sm:$0xff] }
 0x342   :  { %5278 = vrcp.f32 %v1589_v62  ;;  %v7258_v62 = vld [vmem:[#allocation27_spill] sm:$0xff] }
 0x34a   :  { %v5275_v52 = vpop.eup %5274 }
 0x34b   :  { %v5277_v7 = vpop.eup %5276  ;;  %v1593_v51 = vmul.f32 %v5275_v52, %v5273_v2  ;;  %v7256_v2 = vld [vmem:[#allocation24_spill] sm:$0xff]  ;;  %v7257_v52 = vld [vmem:[#allocation10_spill] sm:$0xff] }
 0x34c   :  { %v1592_v26 = vmul.f32 %v5277_v7, %v5987_v49  ;;  %v5279_v28 = vpop.eup %5278  ;;  %v7247_v49 = vld [vmem:[#allocation11_spill] sm:$0xff]  ;;  %v7259_v7 = vld [vmem:[#allocation13_spill] sm:$0xff] }
 0x34e   :  { %v6378_v56 = vadd.f32 %v1593_v51, %v1592_v26  ;;  %v7260_v51 = vld [vmem:[#allocation28_spill] sm:$0xff]  ;;  %v7261_v26 = vld [vmem:[#allocation14_spill] sm:$0xff] }
 0x350   :  { %5280 = vtanh.f32 %v6378_v56 }
 0x35a   :  { %v5281_v45 = vpop.eup %5280 }
 0x35b   :  { %v1596_v48 = vmul.f32 %v5281_v45, %v5279_v28  ;;  %v7262_v28 = vld [vmem:[#allocation29_spill] sm:$0xff]  ;;  %v7264_v45 = vld [vmem:[#allocation30_spill] sm:$0xff] }
 0x35d   :  { %v1607_v44 = vpack.c.bf16 %v1596_v48, %v1596_v48  ;;  %v7265_v48 = vld [vmem:[#allocation18_spill] sm:$0xff] }
 0x35f   :  { %2046 = vmatprep.mubr.bf16.mxu0 %v1607_v44  ;;  %2087 = vmatprep.mubr.bf16.mxu1 %v1607_v44  ;;  %v7267_v44 = vld [vmem:[#allocation21_spill] sm:$0xff] }
 0x360   :  { %2047 = vmatmul.mubr.bf16.vlgmr.msra.gmra.mrb[12].mxu0 %v1606_v0  ;;  %2088 = vmatmul.mubr.bf16.vlgmr.msra.gmra.mrb[12].mxu1 %v1606_v0  ;;  %v7266_v0 = vld [vmem:[#allocation31_spill] sm:$0xff] }
 0x361   :  { %2538 = vmatpush1.bf16.msra.mxu0 %v5993_v5  ;;  %2579 = vmatpush1.bf16.msra.mxu1 %v5998_v58 }
 0x362   :  { %2539 = vmatprep.subr.bf16.mxu0 %v6003_v6  ;;  %2580 = vmatprep.subr.bf16.mxu1 %v6046_v14 }
 0x365   :  { %2540 = vmatpush1.bf16.msra.mxu0 %v6009_v8  ;;  %2581 = vmatpush1.bf16.msra.mxu1 %v6056_v16 }
 0x366   :  { %2541 = vmatprep.subr.bf16.mxu0 %v6016_v9  ;;  %2582 = vmatprep.subr.bf16.mxu1 %v6070_v18 }
 0x369   :  { %2542 = vmatpush1.bf16.msra.mxu0 %v6022_v10  ;;  %2583 = vmatpush1.bf16.msra.mxu1 %v6080_v20 }
 0x36a   :  { %2543 = vmatprep.subr.bf16.mxu0 %v6028_v11  ;;  %2584 = vmatprep.subr.bf16.mxu1 %v6094_v22 }
 0x36d   :  { %2544 = vmatpush1.bf16.msra.mxu0 %v6034_v12  ;;  %2585 = vmatpush1.bf16.msra.mxu1 %v6104_v24 }
 0x36e   :  { %2545 = vmatprep.subr.bf16.mxu0 %v6041_v13  ;;  %2586 = vmatprep.subr.bf16.mxu1 %v6118_v29 }
 0x371   :  { %2546 = vmatpush1.bf16.msra.mxu0 %v6051_v15  ;;  %2587 = vmatpush1.bf16.msra.mxu1 %v6128_v32 }
 0x372   :  { %2547 = vmatprep.subr.bf16.mxu0 %v6065_v17  ;;  %2588 = vmatprep.subr.bf16.mxu1 %v6142_v34 }
 0x375   :  { %2548 = vmatpush1.bf16.msra.mxu0 %v6075_v19  ;;  %2589 = vmatpush1.bf16.msra.mxu1 %v6152_v36 }
 0x376   :  { %2549 = vmatprep.subr.bf16.mxu0 %v6089_v21  ;;  %2590 = vmatprep.subr.bf16.mxu1 %v6166_v38 }
 0x379   :  { %2550 = vmatpush1.bf16.msra.mxu0 %v6099_v23  ;;  %2591 = vmatpush1.bf16.msra.mxu1 %v6176_v40 }
 0x37a   :  { %2551 = vmatprep.subr.bf16.mxu0 %v6113_v27  ;;  %2592 = vmatprep.subr.bf16.mxu1 %v6190_v42 }
 0x37d   :  { %2552 = vmatpush1.bf16.msra.mxu0 %v6123_v31  ;;  %2593 = vmatpush1.bf16.msra.mxu1 %v6200_v46 }
 0x37e   :  { %2553 = vmatprep.subr.bf16.mxu0 %v6137_v33  ;;  %2594 = vmatprep.subr.bf16.mxu1 %v6214_v50 }
 0x381   :  { %2554 = vmatpush1.bf16.msra.mxu0 %v6147_v35  ;;  %2595 = vmatpush1.bf16.msra.mxu1 %v6224_v63 }
 0x382   :  { %2555 = vmatprep.subr.bf16.mxu0 %v6161_v37  ;;  %2596 = vmatprep.subr.bf16.mxu1 %v6248_v3 }
 0x385   :  { %2556 = vmatpush1.bf16.msra.mxu0 %v6171_v39  ;;  %2597 = vmatpush1.bf16.msra.mxu1 %v6243_v43 }
 0x386   :  { %2557 = vmatprep.subr.bf16.mxu0 %v6185_v41  ;;  %2598 = vmatprep.subr.bf16.mxu1 %v6259_v61 }
 0x389   :  { %2558 = vmatpush1.bf16.msra.mxu0 %v7247_v49  ;;  %2599 = vmatpush1.bf16.msra.mxu1 %v7248_v59 }
 0x38a   :  { %2559 = vmatprep.subr.bf16.mxu0 %v7249_v60  ;;  %2600 = vmatprep.subr.bf16.mxu1 %v7250_v1 }
 0x38d   :  { %2560 = vmatpush1.bf16.msra.mxu0 %v7251_v47  ;;  %2601 = vmatpush1.bf16.msra.mxu1 %v7252_v54 }
 0x38e   :  { %2561 = vmatprep.subr.bf16.mxu0 %v7253_v4  ;;  %2602 = vmatprep.subr.bf16.mxu1 %v7254_v53 }
 0x391   :  { %2562 = vmatpush1.bf16.msra.mxu0 %v7255_v25  ;;  %2603 = vmatpush1.bf16.msra.mxu1 %v7256_v2 }
 0x392   :  { %2563 = vmatprep.subr.bf16.mxu0 %v7257_v52  ;;  %2604 = vmatprep.subr.bf16.mxu1 %v7258_v62  ;;  %v7268_v52 = vld [vmem:[#allocation32_spill] sm:$0xff] }
 0x393   :  { %v7269_v62 = vld [vmem:[#allocation8_spill] sm:$0xff] }
 0x395   :  { %2564 = vmatpush1.bf16.msra.mxu0 %v7259_v7  ;;  %2605 = vmatpush1.bf16.msra.mxu1 %v7260_v51  ;;  %v7270_v7 = vld [vmem:[#allocation6_spill] sm:$0xff] }
 0x396   :  { %2565 = vmatprep.subr.bf16.mxu0 %v7261_v26  ;;  %2606 = vmatprep.subr.bf16.mxu1 %v7262_v28 }
 0x399   :  { %2566 = vmatpush1.bf16.msra.mxu0 %v7263_v30  ;;  %2607 = vmatpush1.bf16.msra.mxu1 %v7264_v45  ;;  %v7272_v45 = vld [vmem:[#allocation26_spill] sm:$0xff] }
 0x39a   :  { %2567 = vmatprep.subr.bf16.mxu0 %v7265_v48  ;;  %2608 = vmatprep.subr.bf16.mxu1 %v7266_v0  ;;  %v2122_v48 = vld [vmem:[%s2121_s24] sm:$0x1] }
 0x39b   :  { %v2126_v0 = vld [vmem:[%s2125_s27] sm:$0x1]  ;;  %2123 = vst [vmem:[#allocation2] sm:$0x1] %v2122_v48 }
 0x39c   :  { %2127 = vst [vmem:[#allocation2 + $0x1] sm:$0x1] %v2126_v0  ;;  %v1672_v48 = vld [vmem:[%s7073_s3] sm:$0xf] }
 0x39d   :  { %2568 = vmatpush1.bf16.msra.mxu0 %v7267_v44  ;;  %2609 = vmatpush1.bf16.msra.mxu1 %v7268_v52  ;;  %v2649_v52 = vld [vmem:[%s2648_s10] sm:$0x1]  ;;  %v1681_v30 = vrot.slane %v1672_v48, %v7272_v45 }
 0x39e   :  { %3060 = vmatprep.subr.bf16.mxu0 %v7269_v62  ;;  %3101 = vmatprep.subr.bf16.mxu1 %v7270_v7  ;;  %v2645_v7 = vld [vmem:[%s2644_s7] sm:$0x1] }
 0x39f   :  { %v7271_v0 = vld [vmem:[#allocation25_spill] sm:$0xff] }
 0x3a0   :  { %v1677_v44 = vrot.slane %v1672_v48, %v7271_v0  ;;  %v1685_v0 = vrot.slane %v1672_v48, %v5893_v55 }
 0x3a3   :  { %v2128_v62 = vld [vmem:[#allocation2] sm:$0xff] }
 0x3a4   :  { %2646 = vst [vmem:[#allocation2] sm:$0x1] %v2645_v7  ;;  %2650 = vst [vmem:[#allocation2 + $0x1] sm:$0x1] %v2649_v52  ;;  %v1689_v52 = vrot.slane %v1672_v48, %v5890_v57 }
 0x433   :  { %v2048_v28 = vpop.f32.mrb[12].mxu0  ;;  %v2089_v26 = vpop.f32.mrb[12].mxu1 }
 0x434   :  { %v2049_v51 = vadd.f32 %v2048_v28, %v1677_v44  ;;  %v2050_v2 = vpop.f32.mrb[13].mxu0  ;;  %v2091_v25 = vpop.f32.mrb[13].mxu1  ;;  %v2090_v49 = vadd.f32 %v2089_v26, %v1685_v0 }
 0x435   :  { %v2051_v53 = vadd.f32 %v2050_v2, %v1681_v30  ;;  %v2052_v4 = vpop.f32.mrb[14].mxu0  ;;  %v2093_v54 = vpop.f32.mrb[14].mxu1  ;;  %v2092_v59 = vadd.f32 %v2091_v25, %v1689_v52 }
 0x436   :  { %v4617_v47 = vmul.f32 -1.442695, %v2049_v51  ;;  %v2053_v1 = vpop.f32.mrb[15].mxu0  ;;  %v2094_v7 = vpop.f32.mrb[15].mxu1 }
 0x437   :  { %v4618_v60 = vmul.f32 -1.442695, %v2051_v53  ;;  %v4619_v45 = vmul.f32 -1.442695, %v2092_v59 }
 0x438   :  { %5282 = vpow2.f32 %v4617_v47 }
 0x439   :  { %5284 = vpow2.f32 %v4618_v60 }
 0x43a   :  { %5286 = vpow2.f32 %v4619_v45 }
 0x43b   :  { %5288 = vtanh.f32 %v2090_v49  ;;  %v2129_v49 = vpack.c.bf16 %v2128_v62, %v2128_v62 }
 0x442   :  { %v5283_v61 = vpop.eup %5282 }
 0x443   :  { %v5285_v28 = vpop.eup %5284  ;;  %v2099_v44 = vadd.f32 1.0, %v5283_v61 }
 0x444   :  { %v2105_v4 = vadd.f32 1.0, %v5285_v28  ;;  %v5287_v1 = vpop.eup %5286 }
 0x445   :  { %5290 = vrcp.f32 %v2099_v44  ;;  %v5289_v54 = vpop.eup %5288  ;;  %v2112_v51 = vadd.f32 1.0, %v5287_v1 }
 0x446   :  { %5292 = vrcp.f32 %v2105_v4 }
 0x447   :  { %5294 = vrcp.f32 %v2112_v51 }
 0x44f   :  { %v5291_v2 = vpop.eup %5290 }
 0x450   :  { %v5293_v53 = vpop.eup %5292  ;;  %v2116_v47 = vmul.f32 %v5291_v2, %v5289_v54 }
 0x451   :  { %v2115_v60 = vmul.f32 %v5293_v53, %v6378_v56  ;;  %v5295_v59 = vpop.eup %5294 }
 0x453   :  { %v6465_v25 = vadd.f32 %v2116_v47, %v2115_v60 }
 0x455   :  { %5296 = vtanh.f32 %v6465_v25 }
 0x45f   :  { %v5297_v26 = vpop.eup %5296 }
 0x460   :  { %v2119_v61 = vmul.f32 %v5297_v26, %v5295_v59 }
 0x462   :  { %v2130_v30 = vpack.c.bf16 %v2119_v61, %v2119_v61 }
 0x464   :  { %2569 = vmatprep.mubr.bf16.mxu0 %v2130_v30  ;;  %2610 = vmatprep.mubr.bf16.mxu1 %v2130_v30 }
 0x465   :  { %2570 = vmatmul.mubr.bf16.vlgmr.msra.gmra.mrb[16].mxu0 %v2129_v49  ;;  %2611 = vmatmul.mubr.bf16.vlgmr.msra.gmra.mrb[16].mxu1 %v2129_v49 }
 0x466   :  { %3061 = vmatpush1.bf16.msra.mxu0 %v5993_v5  ;;  %3102 = vmatpush1.bf16.msra.mxu1 %v5998_v58  ;;  %v7273_v5 = vld [vmem:[#allocation16_spill] sm:$0xff]  ;;  %v7274_v58 = vld [vmem:[#allocation11_spill] sm:$0xff] }
 0x467   :  { %3062 = vmatprep.subr.bf16.mxu0 %v6003_v6  ;;  %3103 = vmatprep.subr.bf16.mxu1 %v6046_v14  ;;  %v7275_v6 = vld [vmem:[#allocation19_spill] sm:$0xff]  ;;  %v7282_v14 = vld [vmem:[#allocation9_spill] sm:$0xff] }
 0x46a   :  { %3063 = vmatpush1.bf16.msra.mxu0 %v6009_v8  ;;  %3104 = vmatpush1.bf16.msra.mxu1 %v6056_v16  ;;  %v7276_v8 = vld [vmem:[#allocation7_spill] sm:$0xff]  ;;  %v7284_v16 = vld [vmem:[#allocation10_spill] sm:$0xff] }
 0x46b   :  { %3064 = vmatprep.subr.bf16.mxu0 %v6016_v9  ;;  %3105 = vmatprep.subr.bf16.mxu1 %v6070_v18  ;;  %v7277_v9 = vld [vmem:[#allocation20_spill] sm:$0xff]  ;;  %v7286_v18 = vld [vmem:[#allocation13_spill] sm:$0xff] }
 0x46e   :  { %3065 = vmatpush1.bf16.msra.mxu0 %v6022_v10  ;;  %3106 = vmatpush1.bf16.msra.mxu1 %v6080_v20  ;;  %v7278_v10 = vld [vmem:[#allocation12_spill] sm:$0xff]  ;;  %v7288_v20 = vld [vmem:[#allocation14_spill] sm:$0xff] }
 0x46f   :  { %3066 = vmatprep.subr.bf16.mxu0 %v6028_v11  ;;  %3107 = vmatprep.subr.bf16.mxu1 %v6094_v22  ;;  %v7279_v11 = vld [vmem:[#allocation22_spill] sm:$0xff]  ;;  %v7290_v22 = vld [vmem:[#allocation17_spill] sm:$0xff] }
 0x472   :  { %3067 = vmatpush1.bf16.msra.mxu0 %v6034_v12  ;;  %3108 = vmatpush1.bf16.msra.mxu1 %v6104_v24  ;;  %v7280_v12 = vld [vmem:[#allocation15_spill] sm:$0xff]  ;;  %v7292_v24 = vld [vmem:[#allocation18_spill] sm:$0xff] }
 0x473   :  { %3068 = vmatprep.subr.bf16.mxu0 %v6041_v13  ;;  %3109 = vmatprep.subr.bf16.mxu1 %v6118_v29  ;;  %v7281_v13 = vld [vmem:[#allocation23_spill] sm:$0xff]  ;;  %v7294_v29 = vld [vmem:[#allocation21_spill] sm:$0xff] }
 0x476   :  { %3069 = vmatpush1.bf16.msra.mxu0 %v6051_v15  ;;  %3110 = vmatpush1.bf16.msra.mxu1 %v6128_v32  ;;  %v7283_v15 = vld [vmem:[#allocation24_spill] sm:$0xff]  ;;  %v6533_v32 = vld [vmem:[%s7072_s2 + $0x4] ss:$16 sps:$4 sm:$0xff]  }
 0x477   :  { %3070 = vmatprep.subr.bf16.mxu0 %v6065_v17  ;;  %3111 = vmatprep.subr.bf16.mxu1 %v6142_v34  ;;  %v7285_v17 = vld [vmem:[#allocation27_spill] sm:$0xff]  ;;  %v3168_v34 = vld [vmem:[%s3167_s19] sm:$0x1]  ;;  %s4828_s19 = sld [smem:[#allocation4 + $0x381]] }
 0x47a   :  { %3071 = vmatpush1.bf16.msra.mxu0 %v6075_v19  ;;  %3112 = vmatpush1.bf16.msra.mxu1 %v6152_v36  ;;  %v7287_v19 = vld [vmem:[#allocation28_spill] sm:$0xff] }
 0x47b   :  { %3072 = vmatprep.subr.bf16.mxu0 %v6089_v21  ;;  %3113 = vmatprep.subr.bf16.mxu1 %v6166_v38  ;;  %v7289_v21 = vld [vmem:[#allocation29_spill] sm:$0xff]  ;;  %v6545_v36 = vld [vmem:[%s7072_s2 + $0xc] ss:$16 sps:$4 sm:$0xff]  }
 0x47c   :  { %v7296_v38 = vld [vmem:[#allocation25_spill] sm:$0xff] }
 0x47d   :  { %s3694_s30 = scalar_lea.vmem %s7071_s1, %s4828_s19 }
 0x47e   :  { %3073 = vmatpush1.bf16.msra.mxu0 %v6099_v23  ;;  %3114 = vmatpush1.bf16.msra.mxu1 %v6176_v40  ;;  %v7291_v23 = vld [vmem:[#allocation30_spill] sm:$0xff] }
 0x47f   :  { %3074 = vmatprep.subr.bf16.mxu0 %v6113_v27  ;;  %3115 = vmatprep.subr.bf16.mxu1 %v6190_v42  ;;  %v7293_v27 = vld [vmem:[#allocation31_spill] sm:$0xff]  ;;  %v7297_v40 = vld [vmem:[#allocation26_spill] sm:$0xff] }
 0x482   :  { %3075 = vmatpush1.bf16.msra.mxu0 %v6123_v31  ;;  %3116 = vmatpush1.bf16.msra.mxu1 %v6200_v46  ;;  %v7295_v31 = vld [vmem:[#allocation32_spill] sm:$0xff] }
 0x483   :  { %3076 = vmatprep.subr.bf16.mxu0 %v6137_v33  ;;  %3117 = vmatprep.subr.bf16.mxu1 %v6214_v50  ;;  %v2651_v33 = vld [vmem:[#allocation2] sm:$0xff] }
 0x484   :  { %3169 = vst [vmem:[#allocation2] sm:$0x1] %v3168_v34  ;;  %v6673_v34 = vld [vmem:[%s7072_s2 + $0x68] ss:$16 sps:$4 sm:$0xff]  }
 0x486   :  { %3077 = vmatpush1.bf16.msra.mxu0 %v6147_v35  ;;  %3118 = vmatpush1.bf16.msra.mxu1 %v6224_v63  ;;  %v3172_v35 = vld [vmem:[%s3171_s22] sm:$0x1] }
 0x487   :  { %3078 = vmatprep.subr.bf16.mxu0 %v6161_v37  ;;  %3119 = vmatprep.subr.bf16.mxu1 %v6248_v3  ;;  %3173 = vst [vmem:[#allocation2 + $0x1] sm:$0x1] %v3172_v35  ;;  %v2195_v37 = vld [vmem:[%s7073_s3] sm:$0xf]  ;;  %v6682_v35 = vld [vmem:[%s7072_s2 + $0xe4] ss:$16 sps:$4 sm:$0xff]  }
 0x488   :  { %v2212_v0 = vrot.slane %v2195_v37, %v5890_v57  ;;  %v2208_v44 = vrot.slane %v2195_v37, %v5893_v55 }
 0x48a   :  { %3079 = vmatpush1.bf16.msra.mxu0 %v6171_v39  ;;  %3120 = vmatpush1.bf16.msra.mxu1 %v6243_v43  ;;  %v2200_v39 = vrot.slane %v2195_v37, %v7296_v38 }
 0x48b   :  { %3080 = vmatprep.subr.bf16.mxu0 %v6185_v41  ;;  %3121 = vmatprep.subr.bf16.mxu1 %v7273_v5  ;;  %v2204_v41 = vrot.slane %v2195_v37, %v7297_v40  ;;  %v6687_v37 = vld [vmem:[%s7072_s2 + $0x8c] ss:$16 sps:$4 sm:$0xff]  }
 0x48e   :  { %3081 = vmatpush1.bf16.msra.mxu0 %v7274_v58  ;;  %3122 = vmatpush1.bf16.msra.mxu1 %v7275_v6 }
 0x48f   :  { %3082 = vmatprep.subr.bf16.mxu0 %v7276_v8  ;;  %3123 = vmatprep.subr.bf16.mxu1 %v7277_v9  ;;  %v2652_v9 = vpack.c.bf16 %v2651_v33, %v2651_v33  ;;  %v6668_v33 = vld [vmem:[%s7072_s2 + $0xc0] ss:$16 sps:$4 sm:$0xff]  }
 0x492   :  { %3083 = vmatpush1.bf16.msra.mxu0 %v7278_v10  ;;  %3124 = vmatpush1.bf16.msra.mxu1 %v7279_v11  ;;  %v6562_v11 = vld [vmem:[%s7072_s2] ss:$16 sps:$4 sm:$0xff]  }
 0x493   :  { %3084 = vmatprep.subr.bf16.mxu0 %v7280_v12  ;;  %3125 = vmatprep.subr.bf16.mxu1 %v7281_v13  ;;  %v6567_v12 = vld [vmem:[%s7072_s2 + $0x8] ss:$16 sps:$4 sm:$0xff]   ;;  %v6578_v13 = vld [vmem:[%s7072_s2 + $0x20] ss:$16 sps:$4 sm:$0xff]  }
 0x496   :  { %3085 = vmatpush1.bf16.msra.mxu0 %v7282_v14  ;;  %3126 = vmatpush1.bf16.msra.mxu1 %v7283_v15  ;;  %v6585_v14 = vld [vmem:[%s7072_s2 + $0x44] ss:$16 sps:$4 sm:$0xff]   ;;  %v6591_v15 = vld [vmem:[%s7072_s2 + $0x40] ss:$16 sps:$4 sm:$0xff]  }
 0x497   :  { %3086 = vmatprep.subr.bf16.mxu0 %v7284_v16  ;;  %3127 = vmatprep.subr.bf16.mxu1 %v7285_v17  ;;  %v6597_v16 = vld [vmem:[%s7072_s2 + $0x64] ss:$16 sps:$4 sm:$0xff]   ;;  %v6603_v17 = vld [vmem:[%s7072_s2 + $0x60] ss:$16 sps:$4 sm:$0xff]  }
 0x49a   :  { %3087 = vmatpush1.bf16.msra.mxu0 %v7286_v18  ;;  %3128 = vmatpush1.bf16.msra.mxu1 %v7287_v19  ;;  %v6610_v18 = vld [vmem:[%s7072_s2 + $0x84] ss:$16 sps:$4 sm:$0xff]   ;;  %v6615_v19 = vld [vmem:[%s7072_s2 + $0x2c] ss:$16 sps:$4 sm:$0xff]  }
 0x49b   :  { %3088 = vmatprep.subr.bf16.mxu0 %v7288_v20  ;;  %3129 = vmatprep.subr.bf16.mxu1 %v7289_v21  ;;  %v6620_v20 = vld [vmem:[%s7072_s2 + $0x80] ss:$16 sps:$4 sm:$0xff]   ;;  %v6625_v21 = vld [vmem:[%s7072_s2 + $0x28] ss:$16 sps:$4 sm:$0xff]  }
 0x49e   :  { %3089 = vmatpush1.bf16.msra.mxu0 %v7290_v22  ;;  %3130 = vmatpush1.bf16.msra.mxu1 %v7291_v23  ;;  %v6634_v22 = vld [vmem:[%s7072_s2 + $0xa4] ss:$16 sps:$4 sm:$0xff]   ;;  %v6639_v23 = vld [vmem:[%s7072_s2 + $0x4c] ss:$16 sps:$4 sm:$0xff]  }
 0x49f   :  { %3090 = vmatprep.subr.bf16.mxu0 %v7292_v24  ;;  %3131 = vmatprep.subr.bf16.mxu1 %v7293_v27  ;;  %v6644_v24 = vld [vmem:[%s7072_s2 + $0xa0] ss:$16 sps:$4 sm:$0xff]   ;;  %v6649_v27 = vld [vmem:[%s7072_s2 + $0x48] ss:$16 sps:$4 sm:$0xff]  }
 0x4a2   :  { %3091 = vmatpush1.bf16.msra.mxu0 %v7294_v29  ;;  %3132 = vmatpush1.bf16.msra.mxu1 %v7295_v31  ;;  %v6658_v29 = vld [vmem:[%s7072_s2 + $0xc4] ss:$16 sps:$4 sm:$0xff]   ;;  %v6663_v31 = vld [vmem:[%s7072_s2 + $0x6c] ss:$16 sps:$4 sm:$0xff]  }
 0x4a3   :  { %3583 = vmatprep.subr.bf16.mxu0 %v6533_v32  ;;  %3624 = vmatprep.subr.bf16.mxu1 %v6545_v36 }
 0x538   :  { %v2571_v42 = vpop.f32.mrb[16].mxu0  ;;  %v2612_v46 = vpop.f32.mrb[16].mxu1 }
 0x539   :  { %v2572_v50 = vadd.f32 %v2571_v42, %v2200_v39  ;;  %v2573_v63 = vpop.f32.mrb[17].mxu0  ;;  %v2614_v43 = vpop.f32.mrb[17].mxu1  ;;  %v2613_v1 = vadd.f32 %v2612_v46, %v2208_v44  ;;  %v6692_v39 = vld [vmem:[%s7072_s2 + $0xe0] ss:$16 sps:$4 sm:$0xff]   ;;  %v6706_v42 = vld [vmem:[%s7072_s2 + $0x104] ss:$16 sps:$4 sm:$0xff]  }
 0x53a   :  { %v2574_v3 = vadd.f32 %v2573_v63, %v2204_v41  ;;  %v2575_v56 = vpop.f32.mrb[18].mxu0  ;;  %v2616_v45 = vpop.f32.mrb[18].mxu1  ;;  %v2615_v28 = vadd.f32 %v2614_v43, %v2212_v0  ;;  %v6697_v41 = vld [vmem:[%s7072_s2 + $0x88] ss:$16 sps:$4 sm:$0xff]   ;;  %v6711_v46 = vld [vmem:[%s7072_s2 + $0xac] ss:$16 sps:$4 sm:$0xff]  }
 0x53b   :  { %v4686_v62 = vmul.f32 -1.442695, %v2572_v50  ;;  %v2576_v48 = vpop.f32.mrb[19].mxu0  ;;  %v2617_v52 = vpop.f32.mrb[19].mxu1  ;;  %v6716_v50 = vld [vmem:[%s7072_s2 + $0x100] ss:$16 sps:$4 sm:$0xff]  }
 0x53c   :  { %v4687_v7 = vmul.f32 -1.442695, %v2574_v3  ;;  %v4688_v4 = vmul.f32 -1.442695, %v2615_v28  ;;  %v6721_v63 = vld [vmem:[%s7072_s2 + $0xa8] ss:$16 sps:$4 sm:$0xff]  }
 0x53d   :  { %5298 = vpow2.f32 %v4686_v62  ;;  %v6730_v43 = vld [vmem:[%s7072_s2 + $0x124] ss:$16 sps:$4 sm:$0xff]   ;;  %v6735_v3 = vld [vmem:[%s7072_s2 + $0xcc] ss:$16 sps:$4 sm:$0xff]   ;;  %v6740_v56 = vld [vmem:[%s7072_s2 + $0x120] ss:$16 sps:$4 sm:$0xff]  }
 0x53e   :  { %5300 = vpow2.f32 %v4687_v7  ;;  %v6745_v45 = vld [vmem:[%s7072_s2 + $0xc8] ss:$16 sps:$4 sm:$0xff]   ;;  %v6754_v62 = vld [vmem:[%s7072_s2 + $0x144] ss:$16 sps:$4 sm:$0xff]   ;;  %v6759_v48 = vld [vmem:[%s7072_s2 + $0xec] ss:$16 sps:$4 sm:$0xff]  }
 0x53f   :  { %5302 = vpow2.f32 %v4688_v4  ;;  %v6764_v0 = vld [vmem:[%s7072_s2 + $0x140] ss:$16 sps:$4 sm:$0xff]   ;;  %v6769_v52 = vld [vmem:[%s7072_s2 + $0xe8] ss:$16 sps:$4 sm:$0xff]   ;;  %v6778_v7 = vld [vmem:[%s7072_s2 + $0x164] ss:$16 sps:$4 sm:$0xff]  }
 0x540   :  { %5304 = vtanh.f32 %v2613_v1  ;;  %7298 = vst [vmem:[#allocation8_spill] sm:$0xff] %v6764_v0  ;;  %7299 = vst [vmem:[#allocation6_spill] sm:$0xff] %v6778_v7  ;;  %v6783_v28 = vld [vmem:[%s7072_s2 + $0x10c] ss:$16 sps:$4 sm:$0xff]   ;;  %v6788_v44 = vld [vmem:[%s7072_s2 + $0x160] ss:$16 sps:$4 sm:$0xff]  }
 0x541   :  { %7300 = vst [vmem:[#allocation16_spill] sm:$0xff] %v6788_v44  ;;  %v6793_v4 = vld [vmem:[%s7072_s2 + $0x108] ss:$16 sps:$4 sm:$0xff]   ;;  %v6802_v1 = vld [vmem:[%s7072_s2 + $0x180] ss:$16 sps:$4 sm:$0xff]  }
 0x542   :  { %7301 = vst [vmem:[#allocation11_spill] sm:$0xff] %v6802_v1 }
 0x547   :  { %v5299_v54 = vpop.eup %5298 }
 0x548   :  { %v5301_v2 = vpop.eup %5300  ;;  %v2622_v51 = vadd.f32 1.0, %v5299_v54  ;;  %v6807_v54 = vld [vmem:[%s7072_s2 + $0x184] ss:$16 sps:$4 sm:$0xff]  }
 0x549   :  { %v2628_v53 = vadd.f32 1.0, %v5301_v2  ;;  %v5303_v47 = vpop.eup %5302  ;;  %7302 = vst [vmem:[#allocation19_spill] sm:$0xff] %v6807_v54  ;;  %v6812_v2 = vld [vmem:[%s7072_s2 + $0x128] ss:$16 sps:$4 sm:$0xff]  }
 0x54a   :  { %5306 = vrcp.f32 %v2622_v51  ;;  %v5305_v60 = vpop.eup %5304  ;;  %v2635_v26 = vadd.f32 1.0, %v5303_v47  ;;  %v6817_v51 = vld [vmem:[%s7072_s2 + $0x12c] ss:$16 sps:$4 sm:$0xff]  }
 0x54b   :  { %5308 = vrcp.f32 %v2628_v53  ;;  %v6822_v53 = vld [vmem:[%s7072_s2 + $0x1a4] ss:$16 sps:$4 sm:$0xff]   ;;  %v6828_v47 = vld [vmem:[%s7072_s2 + $0x14c] ss:$16 sps:$4 sm:$0xff]  }
 0x54c   :  { %5310 = vrcp.f32 %v2635_v26  ;;  %7303 = vst [vmem:[#allocation7_spill] sm:$0xff] %v6822_v53  ;;  %7304 = vst [vmem:[#allocation20_spill] sm:$0xff] %v6828_v47  ;;  %v6847_v26 = vld [vmem:[%s7072_s2 + $0x1c4] ss:$16 sps:$4 sm:$0xff]  }
 0x54d   :  { %7307 = vst [vmem:[#allocation15_spill] sm:$0xff] %v6847_v26 }
 0x554   :  { %v5307_v59 = vpop.eup %5306 }
 0x555   :  { %v5309_v61 = vpop.eup %5308  ;;  %v2639_v49 = vmul.f32 %v5307_v59, %v5305_v60  ;;  %v6835_v60 = vld [vmem:[%s7072_s2 + $0x1a0] ss:$16 sps:$4 sm:$0xff]   ;;  %v6842_v59 = vld [vmem:[%s7072_s2 + $0x148] ss:$16 sps:$4 sm:$0xff]  }
 0x556   :  { %v2638_v30 = vmul.f32 %v5309_v61, %v6465_v25  ;;  %v5311_v58 = vpop.eup %5310  ;;  %v6572_v25 = vld [vmem:[%s7072_s2 + $0x24] ss:$16 sps:$4 sm:$0xff]   ;;  %7305 = vst [vmem:[#allocation12_spill] sm:$0xff] %v6835_v60  ;;  %7306 = vst [vmem:[#allocation22_spill] sm:$0xff] %v6842_v59  ;;  %v6853_v61 = vld [vmem:[%s7072_s2 + $0x16c] ss:$16 sps:$4 sm:$0xff]  }
 0x557   :  { %7308 = vst [vmem:[#allocation23_spill] sm:$0xff] %v6853_v61 }
 0x558   :  { %v6556_v5 = vadd.f32 %v2639_v49, %v2638_v30  ;;  %v6859_v49 = vld [vmem:[%s7072_s2 + $0x1c0] ss:$16 sps:$4 sm:$0xff]   ;;  %v6866_v30 = vld [vmem:[%s7072_s2 + $0x168] ss:$16 sps:$4 sm:$0xff]  }
 0x559   :  { %7309 = vst [vmem:[#allocation9_spill] sm:$0xff] %v6859_v49  ;;  %7310 = vst [vmem:[#allocation24_spill] sm:$0xff] %v6866_v30 }
 0x55a   :  { %5312 = vtanh.f32 %v6556_v5 }
 0x564   :  { %v5313_v6 = vpop.eup %5312 }
 0x565   :  { %v2642_v8 = vmul.f32 %v5313_v6, %v5311_v58  ;;  %v6871_v58 = vld [vmem:[%s7072_s2 + $0x1e4] ss:$16 sps:$4 sm:$0xff]   ;;  %v6877_v6 = vld [vmem:[%s7072_s2 + $0x18c] ss:$16 sps:$4 sm:$0xff]  }
 0x566   :  { %7311 = vst [vmem:[#allocation10_spill] sm:$0xff] %v6871_v58  ;;  %7312 = vst [vmem:[#allocation27_spill] sm:$0xff] %v6877_v6 }
 0x567   :  { %v2653_v10 = vpack.c.bf16 %v2642_v8, %v2642_v8  ;;  %v6883_v8 = vld [vmem:[%s7072_s2 + $0x1e0] ss:$16 sps:$4 sm:$0xff]  }
 0x568   :  { %7313 = vst [vmem:[#allocation13_spill] sm:$0xff] %v6883_v8 }
 0x569   :  { %3092 = vmatprep.mubr.bf16.mxu0 %v2653_v10  ;;  %3133 = vmatprep.mubr.bf16.mxu1 %v2653_v10  ;;  %v6898_v10 = vld [vmem:[%s7072_s2 + $0x1ac] ss:$16 sps:$4 sm:$0xff]  }
 0x56a   :  { %3093 = vmatmul.mubr.bf16.vlgmr.msra.gmra.mrb[20].mxu0 %v2652_v9  ;;  %3134 = vmatmul.mubr.bf16.vlgmr.msra.gmra.mrb[20].mxu1 %v2652_v9  ;;  %v6890_v9 = vld [vmem:[%s7072_s2 + $0x188] ss:$16 sps:$4 sm:$0xff]   ;;  %7315 = vst [vmem:[#allocation14_spill] sm:$0xff] %v6898_v10 }
 0x56b   :  { %3584 = vmatpush1.bf16.msra.mxu0 %v6562_v11  ;;  %3625 = vmatpush1.bf16.msra.mxu1 %v6567_v12  ;;  %7314 = vst [vmem:[#allocation28_spill] sm:$0xff] %v6890_v9 }
 0x56c   :  { %3585 = vmatprep.subr.bf16.mxu0 %v6572_v25  ;;  %3626 = vmatprep.subr.bf16.mxu1 %v6615_v19 }
 0x56f   :  { %3586 = vmatpush1.bf16.msra.mxu0 %v6578_v13  ;;  %3627 = vmatpush1.bf16.msra.mxu1 %v6625_v21 }
 0x570   :  { %3587 = vmatprep.subr.bf16.mxu0 %v6585_v14  ;;  %3628 = vmatprep.subr.bf16.mxu1 %v6639_v23 }
 0x573   :  { %3588 = vmatpush1.bf16.msra.mxu0 %v6591_v15  ;;  %3629 = vmatpush1.bf16.msra.mxu1 %v6649_v27 }
 0x574   :  { %3589 = vmatprep.subr.bf16.mxu0 %v6597_v16  ;;  %3630 = vmatprep.subr.bf16.mxu1 %v6663_v31 }
 0x577   :  { %3590 = vmatpush1.bf16.msra.mxu0 %v6603_v17  ;;  %3631 = vmatpush1.bf16.msra.mxu1 %v6673_v34 }
 0x578   :  { %3591 = vmatprep.subr.bf16.mxu0 %v6610_v18  ;;  %3632 = vmatprep.subr.bf16.mxu1 %v6687_v37 }
 0x57b   :  { %3592 = vmatpush1.bf16.msra.mxu0 %v6620_v20  ;;  %3633 = vmatpush1.bf16.msra.mxu1 %v6697_v41 }
 0x57c   :  { %3593 = vmatprep.subr.bf16.mxu0 %v6634_v22  ;;  %3634 = vmatprep.subr.bf16.mxu1 %v6711_v46 }
 0x57f   :  { %3594 = vmatpush1.bf16.msra.mxu0 %v6644_v24  ;;  %3635 = vmatpush1.bf16.msra.mxu1 %v6721_v63 }
 0x580   :  { %3595 = vmatprep.subr.bf16.mxu0 %v6658_v29  ;;  %3636 = vmatprep.subr.bf16.mxu1 %v6735_v3 }
 0x583   :  { %3596 = vmatpush1.bf16.msra.mxu0 %v6668_v33  ;;  %3637 = vmatpush1.bf16.msra.mxu1 %v6745_v45 }
 0x584   :  { %3597 = vmatprep.subr.bf16.mxu0 %v6682_v35  ;;  %3638 = vmatprep.subr.bf16.mxu1 %v6759_v48 }
 0x587   :  { %3598 = vmatpush1.bf16.msra.mxu0 %v6692_v39  ;;  %3639 = vmatpush1.bf16.msra.mxu1 %v6769_v52 }
 0x588   :  { %3599 = vmatprep.subr.bf16.mxu0 %v6706_v42  ;;  %3640 = vmatprep.subr.bf16.mxu1 %v6783_v28 }
 0x58b   :  { %3600 = vmatpush1.bf16.msra.mxu0 %v6716_v50  ;;  %3641 = vmatpush1.bf16.msra.mxu1 %v6793_v4 }
 0x58c   :  { %3601 = vmatprep.subr.bf16.mxu0 %v6730_v43  ;;  %3642 = vmatprep.subr.bf16.mxu1 %v6817_v51 }
 0x58f   :  { %3602 = vmatpush1.bf16.msra.mxu0 %v6740_v56  ;;  %3643 = vmatpush1.bf16.msra.mxu1 %v6812_v2 }
 0x590   :  { %3603 = vmatprep.subr.bf16.mxu0 %v6754_v62  ;;  %3644 = vmatprep.subr.bf16.mxu1 %v6828_v47 }
 0x593   :  { %3604 = vmatpush1.bf16.msra.mxu0 %v6764_v0  ;;  %3645 = vmatpush1.bf16.msra.mxu1 %v6842_v59 }
 0x594   :  { %3605 = vmatprep.subr.bf16.mxu0 %v6778_v7  ;;  %3646 = vmatprep.subr.bf16.mxu1 %v6853_v61 }
 0x597   :  { %3606 = vmatpush1.bf16.msra.mxu0 %v6788_v44  ;;  %3647 = vmatpush1.bf16.msra.mxu1 %v6866_v30 }
 0x598   :  { %3607 = vmatprep.subr.bf16.mxu0 %v6807_v54  ;;  %3648 = vmatprep.subr.bf16.mxu1 %v6877_v6 }
 0x59b   :  { %3608 = vmatpush1.bf16.msra.mxu0 %v6802_v1  ;;  %3649 = vmatpush1.bf16.msra.mxu1 %v6890_v9 }
 0x59c   :  { %3609 = vmatprep.subr.bf16.mxu0 %v6822_v53  ;;  %3650 = vmatprep.subr.bf16.mxu1 %v6898_v10 }
 0x59f   :  { %3610 = vmatpush1.bf16.msra.mxu0 %v6835_v60  ;;  %v3695_v60 = vld [vmem:[%s3694_s30] sm:$0x1] }
 0x5a0   :  { %3611 = vmatprep.subr.bf16.mxu0 %v6847_v26  ;;  %v6934_v26 = vld [vmem:[%s7072_s2 + $0x1e8] ss:$16 sps:$4 sm:$0xff]  }
 0x5a1   :  { %7320 = vst [vmem:[#allocation31_spill] sm:$0xff] %v6934_v26 }
 0x5a3   :  { %3612 = vmatpush1.bf16.msra.mxu0 %v6859_v49  ;;  %v6922_v49 = vld [vmem:[%s7072_s2 + $0x1ec] ss:$16 sps:$4 sm:$0xff]  }
 0x5a4   :  { %3613 = vmatprep.subr.bf16.mxu0 %v6871_v58  ;;  %v6904_v58 = vld [vmem:[%s7072_s2 + $0x1a8] ss:$16 sps:$4 sm:$0xff]   ;;  %7319 = vst [vmem:[#allocation18_spill] sm:$0xff] %v6922_v49 }
 0x5a5   :  { %7316 = vst [vmem:[#allocation29_spill] sm:$0xff] %v6904_v58  ;;  %3651 = vmatpush1.bf16.msra.mxu1 %v6904_v58  ;;  %v3691_v58 = vld [vmem:[%s3690_s28] sm:$0x1] }
 0x5a7   :  { %3614 = vmatpush1.bf16.msra.mxu0 %v6883_v8  ;;  %v6910_v8 = vld [vmem:[%s7072_s2 + $0x1cc] ss:$16 sps:$4 sm:$0xff]  }
 0x5a8   :  { %4106 = vmatprep.subr.bf16.mxu0 %v6533_v32  ;;  %7317 = vst [vmem:[#allocation17_spill] sm:$0xff] %v6910_v8  ;;  %v6916_v32 = vld [vmem:[%s7072_s2 + $0x1c8] ss:$16 sps:$4 sm:$0xff]   ;;  %3652 = vmatprep.subr.bf16.mxu1 %v6910_v8  ;;  %v3174_v8 = vld [vmem:[#allocation2] sm:$0xff] }
 0x5a9   :  { %7318 = vst [vmem:[#allocation30_spill] sm:$0xff] %v6916_v32  ;;  %3653 = vmatpush1.bf16.msra.mxu1 %v6916_v32  ;;  %3692 = vst [vmem:[#allocation2] sm:$0x1] %v3691_v58  ;;  %v2718_v32 = vld [vmem:[%s7073_s3] sm:$0xf] }
 0x5aa   :  { %3654 = vmatprep.subr.bf16.mxu1 %v6922_v49  ;;  %3696 = vst [vmem:[#allocation2 + $0x1] sm:$0x1] %v3695_v60  ;;  %v2723_v10 = vrot.slane %v2718_v32, %v7296_v38  ;;  %v2727_v53 = vrot.slane %v2718_v32, %v7297_v40  ;;  %v2731_v38 = vrot.slane %v2718_v32, %v5893_v55 }
 0x5ad   :  { %3655 = vmatpush1.bf16.msra.mxu1 %v6934_v26 }
 0x5ae   :  { %4147 = vmatprep.subr.bf16.mxu1 %v6545_v36  ;;  %v2735_v36 = vrot.slane %v2718_v32, %v5890_v57 }
 0x63d   :  { %v3094_v9 = vpop.f32.mrb[20].mxu0  ;;  %v3135_v1 = vpop.f32.mrb[20].mxu1 }
 0x63e   :  { %v3095_v6 = vadd.f32 %v3094_v9, %v2723_v10  ;;  %v3096_v54 = vpop.f32.mrb[21].mxu0  ;;  %v3137_v30 = vpop.f32.mrb[21].mxu1  ;;  %v3136_v0 = vadd.f32 %v3135_v1, %v2731_v38 }
 0x63f   :  { %v3097_v49 = vadd.f32 %v3096_v54, %v2727_v53  ;;  %v3098_v58 = vpop.f32.mrb[22].mxu0  ;;  %v3139_v60 = vpop.f32.mrb[22].mxu1  ;;  %v3138_v59 = vadd.f32 %v3137_v30, %v2735_v36 }
 0x640   :  { %v4755_v44 = vmul.f32 -1.442695, %v3095_v6  ;;  %v3099_v26 = vpop.f32.mrb[23].mxu0  ;;  %v3140_v61 = vpop.f32.mrb[23].mxu1 }
 0x641   :  { %v4756_v7 = vmul.f32 -1.442695, %v3097_v49  ;;  %v4757_v40 = vmul.f32 -1.442695, %v3138_v59 }
 0x642   :  { %5314 = vpow2.f32 %v4755_v44 }
 0x643   :  { %5316 = vpow2.f32 %v4756_v7 }
 0x644   :  { %5318 = vpow2.f32 %v4757_v40 }
 0x645   :  { %5320 = vtanh.f32 %v3136_v0  ;;  %v3175_v0 = vpack.c.bf16 %v3174_v8, %v3174_v8 }
 0x64c   :  { %v5315_v47 = vpop.eup %5314 }
 0x64d   :  { %v5317_v9 = vpop.eup %5316  ;;  %v3145_v10 = vadd.f32 1.0, %v5315_v47 }
 0x64e   :  { %v3151_v54 = vadd.f32 1.0, %v5317_v9  ;;  %v5319_v53 = vpop.eup %5318 }
 0x64f   :  { %5322 = vrcp.f32 %v3145_v10  ;;  %v5321_v26 = vpop.eup %5320  ;;  %v3158_v61 = vadd.f32 1.0, %v5319_v53 }
 0x650   :  { %5324 = vrcp.f32 %v3151_v54 }
 0x651   :  { %5326 = vrcp.f32 %v3158_v61 }
 0x659   :  { %v5323_v6 = vpop.eup %5322 }
 0x65a   :  { %v5325_v49 = vpop.eup %5324  ;;  %v3162_v44 = vmul.f32 %v5323_v6, %v5321_v26 }
 0x65b   :  { %v3161_v7 = vmul.f32 %v5325_v49, %v6556_v5  ;;  %v5327_v38 = vpop.eup %5326  ;;  %v7321_v5 = vld [vmem:[#allocation20_spill] sm:$0xff] }
 0x65d   :  { %v6947_v30 = vadd.f32 %v3162_v44, %v3161_v7 }
 0x65f   :  { %5328 = vtanh.f32 %v6947_v30 }
 0x669   :  { %v5329_v40 = vpop.eup %5328 }
 0x66a   :  { %v3165_v1 = vmul.f32 %v5329_v40, %v5327_v38 }
 0x66c   :  { %v3176_v47 = vpack.c.bf16 %v3165_v1, %v3165_v1 }
 0x66e   :  { %3615 = vmatprep.mubr.bf16.mxu0 %v3176_v47  ;;  %3656 = vmatprep.mubr.bf16.mxu1 %v3176_v47 }
 0x66f   :  { %3616 = vmatmul.mubr.bf16.vlgmr.msra.gmra.mrb[24].mxu0 %v3175_v0  ;;  %3657 = vmatmul.mubr.bf16.vlgmr.msra.gmra.mrb[24].mxu1 %v3175_v0  ;;  %v3697_v0 = vld [vmem:[#allocation2] sm:$0xff] }
 0x670   :  { %4107 = vmatpush1.bf16.msra.mxu0 %v6562_v11  ;;  %4148 = vmatpush1.bf16.msra.mxu1 %v6567_v12  ;;  %v7322_v11 = vld [vmem:[#allocation8_spill] sm:$0xff]  ;;  %v7323_v12 = vld [vmem:[#allocation22_spill] sm:$0xff] }
 0x671   :  { %4108 = vmatprep.subr.bf16.mxu0 %v6572_v25  ;;  %4149 = vmatprep.subr.bf16.mxu1 %v6615_v19  ;;  %v7324_v25 = vld [vmem:[#allocation6_spill] sm:$0xff]  ;;  %v7331_v19 = vld [vmem:[#allocation28_spill] sm:$0xff] }
 0x674   :  { %4109 = vmatpush1.bf16.msra.mxu0 %v6578_v13  ;;  %4150 = vmatpush1.bf16.msra.mxu1 %v6625_v21  ;;  %v7325_v13 = vld [vmem:[#allocation23_spill] sm:$0xff]  ;;  %v7333_v21 = vld [vmem:[#allocation14_spill] sm:$0xff] }
 0x675   :  { %4110 = vmatprep.subr.bf16.mxu0 %v6585_v14  ;;  %4151 = vmatprep.subr.bf16.mxu1 %v6639_v23  ;;  %v7326_v14 = vld [vmem:[#allocation16_spill] sm:$0xff]  ;;  %v7335_v23 = vld [vmem:[#allocation29_spill] sm:$0xff] }
 0x678   :  { %4111 = vmatpush1.bf16.msra.mxu0 %v6591_v15  ;;  %4152 = vmatpush1.bf16.msra.mxu1 %v6649_v27  ;;  %v7327_v15 = vld [vmem:[#allocation24_spill] sm:$0xff]  ;;  %v7337_v27 = vld [vmem:[#allocation17_spill] sm:$0xff] }
 0x679   :  { %4112 = vmatprep.subr.bf16.mxu0 %v6597_v16  ;;  %4153 = vmatprep.subr.bf16.mxu1 %v6663_v31  ;;  %v7328_v16 = vld [vmem:[#allocation19_spill] sm:$0xff]  ;;  %v7339_v31 = vld [vmem:[#allocation30_spill] sm:$0xff] }
 0x67c   :  { %4113 = vmatpush1.bf16.msra.mxu0 %v6603_v17  ;;  %4154 = vmatpush1.bf16.msra.mxu1 %v6673_v34  ;;  %v7329_v17 = vld [vmem:[#allocation27_spill] sm:$0xff]  ;;  %v7341_v34 = vld [vmem:[#allocation18_spill] sm:$0xff] }
 0x67d   :  { %4114 = vmatprep.subr.bf16.mxu0 %v6610_v18  ;;  %4155 = vmatprep.subr.bf16.mxu1 %v6687_v37  ;;  %v7330_v18 = vld [vmem:[#allocation11_spill] sm:$0xff] }
 0x67e   :  { %v7343_v37 = vld [vmem:[#allocation31_spill] sm:$0xff] }
 0x680   :  { %4115 = vmatpush1.bf16.msra.mxu0 %v6620_v20  ;;  %4156 = vmatpush1.bf16.msra.mxu1 %v6697_v41  ;;  %v7332_v20 = vld [vmem:[#allocation7_spill] sm:$0xff]  ;;  %v3241_v41 = vld [vmem:[%s7073_s3] sm:$0xf] }
 0x681   :  { %4116 = vmatprep.subr.bf16.mxu0 %v6634_v22  ;;  %4157 = vmatprep.subr.bf16.mxu1 %v6711_v46  ;;  %v7334_v22 = vld [vmem:[#allocation12_spill] sm:$0xff]  ;;  %v3254_v58 = vrot.slane %v3241_v41, %v5893_v55 }
 0x684   :  { %4117 = vmatpush1.bf16.msra.mxu0 %v6644_v24  ;;  %4158 = vmatpush1.bf16.msra.mxu1 %v6721_v63  ;;  %v7336_v24 = vld [vmem:[#allocation15_spill] sm:$0xff] }
 0x685   :  { %4118 = vmatprep.subr.bf16.mxu0 %v6658_v29  ;;  %4159 = vmatprep.subr.bf16.mxu1 %v6735_v3  ;;  %v7338_v29 = vld [vmem:[#allocation9_spill] sm:$0xff] }
 0x688   :  { %4119 = vmatpush1.bf16.msra.mxu0 %v6668_v33  ;;  %4160 = vmatpush1.bf16.msra.mxu1 %v6745_v45  ;;  %v7340_v33 = vld [vmem:[#allocation10_spill] sm:$0xff] }
 0x689   :  { %4120 = vmatprep.subr.bf16.mxu0 %v6682_v35  ;;  %4161 = vmatprep.subr.bf16.mxu1 %v6759_v48  ;;  %v7342_v35 = vld [vmem:[#allocation13_spill] sm:$0xff] }
 0x68c   :  { %4121 = vmatpush1.bf16.msra.mxu0 %v6692_v39  ;;  %4162 = vmatpush1.bf16.msra.mxu1 %v6769_v52  ;;  %v7344_v39 = vmov 0.0  }
 0x68d   :  { %4122 = vmatprep.subr.bf16.mxu0 %v6706_v42  ;;  %4163 = vmatprep.subr.bf16.mxu1 %v6783_v28  ;;  %v7345_v42 = vld [vmem:[#allocation25_spill] sm:$0xff] }
 0x68e   :  { %v3246_v46 = vrot.slane %v3241_v41, %v7345_v42 }
 0x690   :  { %4123 = vmatpush1.bf16.msra.mxu0 %v6716_v50  ;;  %4164 = vmatpush1.bf16.msra.mxu1 %v6793_v4  ;;  %v7346_v50 = vld [vmem:[#allocation26_spill] sm:$0xff] }
 0x691   :  { %4124 = vmatprep.subr.bf16.mxu0 %v6730_v43  ;;  %4165 = vmatprep.subr.bf16.mxu1 %v6817_v51  ;;  %v3250_v63 = vrot.slane %v3241_v41, %v7346_v50  ;;  %v3258_v51 = vrot.slane %v3241_v41, %v5890_v57 }
 0x694   :  { %4125 = vmatpush1.bf16.msra.mxu0 %v6740_v56  ;;  %4166 = vmatpush1.bf16.msra.mxu1 %v6812_v2 }
 0x695   :  { %4126 = vmatprep.subr.bf16.mxu0 %v6754_v62  ;;  %4167 = vmatprep.subr.bf16.mxu1 %v7321_v5 }
 0x698   :  { %4127 = vmatpush1.bf16.msra.mxu0 %v7322_v11  ;;  %4168 = vmatpush1.bf16.msra.mxu1 %v7323_v12  ;;  %v3698_v11 = vpack.c.bf16 %v3697_v0, %v3697_v0 }
 0x699   :  { %4128 = vmatprep.subr.bf16.mxu0 %v7324_v25  ;;  %4169 = vmatprep.subr.bf16.mxu1 %v7325_v13  ;;  %v5226_v25 = vld [vmem:[%s7074_s4] sm:$0xff]   ;;  %v5228_v13 = vld [vmem:[%s7074_s4 + $0x10] sm:$0xff]  }
 0x69c   :  { %4129 = vmatpush1.bf16.msra.mxu0 %v7326_v14  ;;  %4170 = vmatpush1.bf16.msra.mxu1 %v7327_v15  ;;  %v5229_v14 = vld [vmem:[%s7074_s4 + $0x18] sm:$0xff]   ;;  %v5230_v15 = vld [vmem:[%s7074_s4 + $0x20] sm:$0xff]  }
 0x69d   :  { %4130 = vmatprep.subr.bf16.mxu0 %v7328_v16  ;;  %4171 = vmatprep.subr.bf16.mxu1 %v7329_v17  ;;  %v5231_v16 = vld [vmem:[%s7074_s4 + $0x28] sm:$0xff]   ;;  %v5232_v17 = vld [vmem:[%s7074_s4 + $0x30] sm:$0xff]  }
 0x6a0   :  { %4131 = vmatpush1.bf16.msra.mxu0 %v7330_v18  ;;  %4172 = vmatpush1.bf16.msra.mxu1 %v7331_v19  ;;  %v5233_v18 = vld [vmem:[%s7074_s4 + $0x38] sm:$0xff]   ;;  %v3764_v19 = vld [vmem:[%s7073_s3] sm:$0xf] }
 0x6a1   :  { %4132 = vmatprep.subr.bf16.mxu0 %v7332_v20  ;;  %4173 = vmatprep.subr.bf16.mxu1 %v7333_v21  ;;  %v3769_v20 = vrot.slane %v3764_v19, %v7345_v42  ;;  %v3773_v21 = vrot.slane %v3764_v19, %v7346_v50  ;;  %v3777_v42 = vrot.slane %v3764_v19, %v5893_v55 }
 0x6a4   :  { %4133 = vmatpush1.bf16.msra.mxu0 %v7334_v22  ;;  %4174 = vmatpush1.bf16.msra.mxu1 %v7335_v23 }
 0x6a5   :  { %4134 = vmatprep.subr.bf16.mxu0 %v7336_v24  ;;  %4175 = vmatprep.subr.bf16.mxu1 %v7337_v27 }
 0x6a8   :  { %4135 = vmatpush1.bf16.msra.mxu0 %v7338_v29  ;;  %4176 = vmatpush1.bf16.msra.mxu1 %v7339_v31 }
 0x6a9   :  { %4136 = vmatprep.subr.bf16.mxu0 %v7340_v33  ;;  %4177 = vmatprep.subr.bf16.mxu1 %v7341_v34 }
 0x6ac   :  { %4137 = vmatpush1.bf16.msra.mxu0 %v7342_v35  ;;  %4178 = vmatpush1.bf16.msra.mxu1 %v7343_v37 }
 0x6ad   :  { %4914 = vmatprep.subr.bf16.mxu0 %v7344_v39 }
 0x742   :  { %v3617_v43 = vpop.f32.mrb[24].mxu0  ;;  %v3658_v3 = vpop.f32.mrb[24].mxu1 }
 0x743   :  { %v3618_v56 = vadd.f32 %v3617_v43, %v3246_v46  ;;  %v3619_v45 = vpop.f32.mrb[25].mxu0  ;;  %v3660_v62 = vpop.f32.mrb[25].mxu1  ;;  %v3659_v36 = vadd.f32 %v3658_v3, %v3254_v58 }
 0x744   :  { %v3620_v48 = vadd.f32 %v3619_v45, %v3250_v63  ;;  %v3621_v52 = vpop.f32.mrb[26].mxu0  ;;  %v3662_v28 = vpop.f32.mrb[26].mxu1  ;;  %v3661_v32 = vadd.f32 %v3660_v62, %v3258_v51 }
 0x745   :  { %v4824_v4 = vmul.f32 -1.442695, %v3618_v56  ;;  %v3622_v2 = vpop.f32.mrb[27].mxu0  ;;  %v3663_v59 = vpop.f32.mrb[27].mxu1 }
 0x746   :  { %v4825_v8 = vmul.f32 -1.442695, %v3620_v48  ;;  %v4826_v60 = vmul.f32 -1.442695, %v3661_v32 }
 0x747   :  { %5330 = vpow2.f32 %v4824_v4 }
 0x748   :  { %5332 = vpow2.f32 %v4825_v8 }
 0x749   :  { %5334 = vpow2.f32 %v4826_v60  ;;  %v4896_v60 = vld [vmem:[%s7075_s5] ss:$0 sm:$0xff] }
 0x74a   :  { %5336 = vtanh.f32 %v3659_v36 }
 0x751   :  { %v5331_v9 = vpop.eup %5330 }
 0x752   :  { %v5333_v10 = vpop.eup %5332  ;;  %v3668_v54 = vadd.f32 1.0, %v5331_v9 }
 0x753   :  { %v3674_v53 = vadd.f32 1.0, %v5333_v10  ;;  %v5335_v26 = vpop.eup %5334 }
 0x754   :  { %5338 = vrcp.f32 %v3668_v54  ;;  %v5337_v6 = vpop.eup %5336  ;;  %v3681_v49 = vadd.f32 1.0, %v5335_v26 }
 0x755   :  { %5340 = vrcp.f32 %v3674_v53 }
 0x756   :  { %5342 = vrcp.f32 %v3681_v49 }
 0x75e   :  { %v5339_v61 = vpop.eup %5338 }
 0x75f   :  { %v5341_v44 = vpop.eup %5340  ;;  %v3685_v7 = vmul.f32 %v5339_v61, %v5337_v6 }
 0x760   :  { %v3684_v38 = vmul.f32 %v5341_v44, %v6947_v30  ;;  %v5343_v1 = vpop.eup %5342  ;;  %v5227_v30 = vld [vmem:[%s7074_s4 + $0x8] sm:$0xff]  }
 0x762   :  { %v7021_v40 = vadd.f32 %v3685_v7, %v3684_v38 }
 0x764   :  { %5344 = vtanh.f32 %v7021_v40 }
 0x76e   :  { %v5345_v47 = vpop.eup %5344 }
 0x76f   :  { %v3688_v5 = vmul.f32 %v5345_v47, %v5343_v1 }
 0x771   :  { %v3699_v12 = vpack.c.bf16 %v3688_v5, %v3688_v5 }
 0x773   :  { %4138 = vmatprep.mubr.bf16.mxu0 %v3699_v12  ;;  %4179 = vmatprep.mubr.bf16.mxu1 %v3699_v12 }
 0x774   :  { %4139 = vmatmul.mubr.bf16.vlgmr.msra.gmra.mrb[28].mxu0 %v3698_v11  ;;  %4180 = vmatmul.mubr.bf16.vlgmr.msra.gmra.mrb[28].mxu1 %v3698_v11 }
 0x775   :  { %4915 = vmatpush3.bf16.msra.mxu0 %v5226_v25  ;;  %4930 = vmatprep.mubr.msk.bf16.mxu0 %vm5379_vm0, %v7344_v39 }
 0x776   :  { %4916 = vmatprep.subr.bf16.mxu0 %v7344_v39 }
 0x779   :  { %4917 = vmatpush3.bf16.msra.mxu0 %v5227_v30 }
 0x77a   :  { %4918 = vmatprep.subr.bf16.mxu0 %v7344_v39 }
 0x77d   :  { %4919 = vmatpush3.bf16.msra.mxu0 %v5228_v13 }
 0x77e   :  { %4920 = vmatprep.subr.bf16.mxu0 %v7344_v39 }
 0x781   :  { %4921 = vmatpush3.bf16.msra.mxu0 %v5229_v14 }
 0x782   :  { %4922 = vmatprep.subr.bf16.mxu0 %v7344_v39 }
 0x785   :  { %4923 = vmatpush3.bf16.msra.mxu0 %v5230_v15 }
 0x786   :  { %4924 = vmatprep.subr.bf16.mxu0 %v7344_v39 }
 0x789   :  { %4925 = vmatpush3.bf16.msra.mxu0 %v5231_v16 }
 0x78a   :  { %4926 = vmatprep.subr.bf16.mxu0 %v7344_v39 }
 0x78d   :  { %4927 = vmatpush3.bf16.msra.mxu0 %v5232_v17 }
 0x78e   :  { %4928 = vmatprep.subr.bf16.mxu0 %v7344_v39  ;;  %v3781_v39 = vrot.slane %v3764_v19, %v5890_v57 }
 0x791   :  { %4929 = vmatpush3.bf16.msra.mxu0 %v5233_v18 }
 0x847   :  { %v4140_v22 = vpop.f32.mrb[28].mxu0  ;;  %v4181_v23 = vpop.f32.mrb[28].mxu1 }
 0x848   :  { %v4141_v24 = vadd.f32 %v4140_v22, %v3769_v20  ;;  %v4142_v27 = vpop.f32.mrb[29].mxu0  ;;  %v4183_v29 = vpop.f32.mrb[29].mxu1  ;;  %v4182_v43 = vadd.f32 %v4181_v23, %v3777_v42 }
 0x849   :  { %v4143_v31 = vadd.f32 %v4142_v27, %v3773_v21  ;;  %v4144_v33 = vpop.f32.mrb[30].mxu0  ;;  %v4185_v34 = vpop.f32.mrb[30].mxu1  ;;  %v4184_v63 = vadd.f32 %v4183_v29, %v3781_v39 }
 0x84a   :  { %v4893_v35 = vmul.f32 -1.442695, %v4141_v24  ;;  %v4145_v37 = vpop.f32.mrb[31].mxu0  ;;  %v4186_v41 = vpop.f32.mrb[31].mxu1 }
 0x84b   :  { %v4894_v46 = vmul.f32 -1.442695, %v4143_v31  ;;  %v4895_v50 = vmul.f32 -1.442695, %v4184_v63 }
 0x84c   :  { %5346 = vpow2.f32 %v4893_v35 }
 0x84d   :  { %5348 = vpow2.f32 %v4894_v46 }
 0x84e   :  { %5350 = vpow2.f32 %v4895_v50 }
 0x84f   :  { %5352 = vtanh.f32 %v4182_v43 }
 0x856   :  { %v5347_v3 = vpop.eup %5346 }
 0x857   :  { %v5349_v56 = vpop.eup %5348  ;;  %v4191_v45 = vadd.f32 1.0, %v5347_v3 }
 0x858   :  { %v4197_v62 = vadd.f32 1.0, %v5349_v56  ;;  %v5351_v48 = vpop.eup %5350 }
 0x859   :  { %5354 = vrcp.f32 %v4191_v45  ;;  %v5353_v52 = vpop.eup %5352  ;;  %v4204_v28 = vadd.f32 1.0, %v5351_v48 }
 0x85a   :  { %5356 = vrcp.f32 %v4197_v62 }
 0x85b   :  { %5358 = vrcp.f32 %v4204_v28 }
 0x863   :  { %v5355_v57 = vpop.eup %5354 }
 0x864   :  { %v5357_v4 = vpop.eup %5356  ;;  %v4208_v2 = vmul.f32 %v5355_v57, %v5353_v52 }
 0x865   :  { %v4207_v51 = vmul.f32 %v5357_v4, %v7021_v40  ;;  %v5359_v55 = vpop.eup %5358 }
 0x867   :  { %v4209_v59 = vadd.f32 %v4208_v2, %v4207_v51 }
 0x869   :  { %5360 = vtanh.f32 %v4209_v59 }
 0x873   :  { %v5361_v8 = vpop.eup %5360 }
 0x874   :  { %v4211_v32 = vmul.f32 %v5361_v8, %v5359_v55 }
 0x876   :  { %v4212_v58 = vpack.c.bf16 %v4211_v32, %v4211_v32 }
 0x878   :  { %4931 = vmatmul.mubr.bf16.vlgmr.msra.gmra.mrb[32].mxu0 %v4212_v58 }
 0x94b   :  { %v4318_v36 = vpop.f32.mrb[32].mxu0 }
 0x94c   :  { %v4319_v9 = vadd.f32 %v4896_v60, %v4318_v36  ;;  %v4932_v10 = vpop.f32.mrb[33].mxu0 }
 0x94d   :  { %v4321_v54 = vpop.f32.mrb[34].mxu0 }
 0x94e   :  { %4324 = vst [vmem:[%s7076_s6] sm:$0xff] %v4319_v9  ;;  %v4933_v53 = vpop.f32.mrb[35].mxu0 }

</bundles_post_ra>
